<compile_context>
chip_gen: v7x
topology: tpu7x:2x2x1
jax: 0.10.0
libtpu: 0.0.40
codegen_flags: <defaults>
</compile_context>

<pallas_src>
import jax
import jax.numpy as jnp
from jax.experimental import pallas as pl
from jax.experimental.pallas import tpu as pltpu


def _discriminator_kernel(
    z_ref, labels_ref,
    wlab_ref, blab_ref,
    w1z_ref, w1e_ref, b1_ref,
    w2_ref, b2_ref,
    w3_ref, b3_ref,
    out_ref,
):
  wdt = wlab_ref.dtype                 # MXU input dtype for weights (bf16)

  # fc_label + ReLU  (labels already bf16 from the wrapper)
  emb = jnp.dot(labels_ref[...], wlab_ref[...],
                preferred_element_type=jnp.float32)
  emb = jnp.maximum(emb + blab_ref[...], 0.0)                 # (TB, H) f32

  # fc1 on concat([z, emb]) == z @ W1[:Z] + emb @ W1[Z:]
  h1 = (jnp.dot(z_ref[...], w1z_ref[...],
                preferred_element_type=jnp.float32)
        + jnp.dot(emb.astype(wdt), w1e_ref[...],
                  preferred_element_type=jnp.float32)
        + b1_ref[...])
  h1 = jnp.maximum(h1, 0.0)                                   # (TB, H)

  # fc2 + ReLU
  h2 = jnp.dot(h1.astype(wdt), w2_ref[...],
               preferred_element_type=jnp.float32) + b2_ref[...]
  h2 = jnp.maximum(h2, 0.0)                                   # (TB, H)

  # fc3 -> lane-padded logits (real logit is column 0; padding cols are 0).
  out_ref[...] = (jnp.dot(h2.astype(wdt), w3_ref[...],
                          preferred_element_type=jnp.float32)
                  + b3_ref[...])                              # (TB, 128)


def _pick_batch_tile(batch, max_tile):
  """Largest multiple of 8 that divides the (padded) batch, capped at max_tile."""
  for cand in (max_tile, 512, 256, 128, 64, 32, 16, 8):
    if (cand <= max_tile and cand <= batch and batch % cand == 0
        and cand % 8 == 0):
      return cand
  return batch   # whole-batch tile (block == full dim is always legal)


def _pick_vmem_limit():
  """Generation-dependent VMEM limit with a conservative fallback."""
  try:
    cap = pltpu.get_tpu_info().vmem_capacity_bytes
  except Exception:
    cap = None
  if cap is not None and cap >= (100 << 20):   # v5e / v6e: 128 MiB physical
    return 96 << 20
  return 48 << 20                              # v7x: 64 MiB physical


def discriminator_forward(z, labels, params, *,
                          weight_dtype=jnp.bfloat16, max_batch_tile=256,
                          single_buffer_weights=True):
  """Run the Discriminator forward pass as a single Pallas kernel."""
  B, z_dim = z.shape
  label_dim = labels.shape[1]
  wlab, blab, w1, b1, w2, b2, w3, b3 = params
  hidden = w2.shape[0]

  # Pad the batch to a multiple of 8 so pipelining / core split stay enabled.
  pad_b = (-B) % 8
  if pad_b:
    z = jnp.pad(z, ((0, pad_b), (0, 0)))
    labels = jnp.pad(labels, ((0, pad_b), (0, 0)))
  Bp = B + pad_b

  tb = _pick_batch_tile(Bp, max_batch_tile)
  grid = (Bp // tb,)

  # Pre-split W1 (z rows vs embedding rows) -> no in-kernel concat.
  # Weights stored in bf16 (kernel is weight-HBM bound); f32 accumulation.
  w1z = w1[:z_dim, :].astype(weight_dtype)
  w1e = w1[z_dim:, :].astype(weight_dtype)
  wlab_c = wlab.astype(weight_dtype)
  w2_c = w2.astype(weight_dtype)

  # Lane-dense final layer: pad output columns to a multiple of 128.
  out_cols = w3.shape[1]
  out_pad = (-(-out_cols // 128)) * 128
  w3p = jnp.pad(w3.astype(weight_dtype), ((0, 0), (0, out_pad - out_cols)))
  b3p = jnp.pad(b3.reshape(1, -1).astype(jnp.float32),
                ((0, 0), (0, out_pad - out_cols)))

  # Biases f32, shaped (1, H): broadcast add in-kernel, fetched once.
  blab2 = blab.reshape(1, -1).astype(jnp.float32)
  b12 = b1.reshape(1, -1).astype(jnp.float32)
  b22 = b2.reshape(1, -1).astype(jnp.float32)

  # bf16 activations at the kernel boundary: halves per-step activation DMA.
  z_c = z.astype(weight_dtype)
  labels_c = labels.astype(weight_dtype)

  vmem_limit = _pick_vmem_limit()

  def batch_spec(feat):
    return pl.BlockSpec((tb, feat), lambda i: (i, 0))

  def build_and_run(single_buffer):
    if single_buffer:
      def resident_spec(shape):
        # Constant block index + single buffer: DMA'd once, stays in VMEM,
        # no double-buffer copy of multi-MiB weight tiles.
        return pl.BlockSpec(shape, lambda i: (0, 0),
                            pipeline_mode=pl.Buffered(1))
    else:
      def resident_spec(shape):
        return pl.BlockSpec(shape, lambda i: (0, 0))

    return pl.pallas_call(
        _discriminator_kernel,
        out_shape=jax.ShapeDtypeStruct((Bp, out_pad), jnp.float32),
        grid=grid,
        in_specs=[
            batch_spec(z_dim),
            batch_spec(label_dim),
            resident_spec(wlab_c.shape),
            resident_spec(blab2.shape),
            resident_spec(w1z.shape),
            resident_spec(w1e.shape),
            resident_spec(b12.shape),
            resident_spec(w2_c.shape),
            resident_spec(b22.shape),
            resident_spec(w3p.shape),
            resident_spec(b3p.shape),
        ],
        out_specs=batch_spec(out_pad),
        compiler_params=pltpu.CompilerParams(
            # Independent batch tiles -> megacore split when grid > 1.
            dimension_semantics=("parallel",),
            vmem_limit_bytes=vmem_limit,
        ),
    )(z_c, labels_c, wlab_c, blab2, w1z, w1e, b12, w2_c, b22, w3p, b3p)

  if single_buffer_weights:
    try:
      out = build_and_run(True)
    except Exception:
      # pipeline_mode / Buffered(1) unsupported on this JAX build: fall back.
      out = build_and_run(False)
  else:
    out = build_and_run(False)

  return out[:B, :out_cols]


def discriminator_reference(z, labels, params, weight_dtype=jnp.bfloat16):
  """Pure-JAX reference (uses an explicit concat, unlike the kernel)."""
  wlab, blab, w1, b1, w2, b2, w3, b3 = params

  def mm(a, w):
    return jnp.dot(a.astype(weight_dtype), w.astype(weight_dtype),
                   preferred_element_type=jnp.float32)

  emb = jax.nn.relu(mm(labels, wlab) + blab)
  x = jnp.concatenate([z, emb], axis=-1)
  h = jax.nn.relu(mm(x, w1) + b1)
  h = jax.nn.relu(mm(h, w2) + b2)
  return mm(h, w3) + b3


def init_params(key, z_dim, hidden, label_dim=10):
  """Deterministic parameter init (shapes mirror the PyTorch module)."""
  ks = jax.random.split(key, 8)
  scale = 0.05

  def w(k, shape):
    return scale * jax.random.normal(k, shape, dtype=jnp.float32)

  wlab = w(ks[0], (label_dim, hidden))          # fc_label: Linear(10, H)
  blab = w(ks[1], (hidden,))
  w1 = w(ks[2], (z_dim + hidden, hidden))       # fc_layers[0]: Linear(Z+H, H)
  b1 = w(ks[3], (hidden,))
  w2 = w(ks[4], (hidden, hidden))               # fc_layers[2]: Linear(H, H)
  b2 = w(ks[5], (hidden,))
  w3 = w(ks[6], (hidden, 1))                    # fc_layers[4]: Linear(H, 1)
  b3 = w(ks[7], (1,))
  return (wlab, blab, w1, b1, w2, b2, w3, b3)


if __name__ == "__main__":
  # Real module: z_dim = hidden = 2048, label_dim = 10, output = 1.
  # Scaled-down but structure-preserving test shapes.
  B = 128
  Z_DIM = 256
  HIDDEN = 256
  LABEL_DIM = 10

  key = jax.random.PRNGKey(0)
  kz, kl, kp = jax.random.split(key, 3)

  z = jax.random.normal(kz, (B, Z_DIM), dtype=jnp.float32)
  labels = jax.random.normal(kl, (B, LABEL_DIM), dtype=jnp.float32)
  params = init_params(kp, Z_DIM, HIDDEN, LABEL_DIM)

  # max_batch_tile=64 -> grid=(2,): exercises the batch pipeline + core split.
  out = discriminator_forward(z, labels, params, max_batch_tile=64)
  out = jax.block_until_ready(out)
  assert out.shape == (B, 1), out.shape

  # Tight check vs a pure-JAX reference using the same bf16-weight /
  # f32-accumulate arithmetic.
  ref = discriminator_reference(z, labels, params, weight_dtype=jnp.bfloat16)
  assert jnp.allclose(out, ref, atol=2e-3, rtol=2e-3), "mismatch vs bf16 reference"

  # Loose sanity check vs full-f32 module semantics.
  ref_f32 = discriminator_reference(z, labels, params, weight_dtype=jnp.float32)
  assert jnp.allclose(out, ref_f32, atol=5e-2, rtol=5e-2), "mismatch vs f32 reference"

  print("KERNEL_OK")
</pallas_src>

<mosaic_0001>
module attributes {stable_mosaic.version = 11 : i64} {
  func.func @_discriminator_kernel(%arg0: i32, %arg1: memref<64x256xbf16, #tpu.memory_space<vmem>>, %arg2: memref<64x10xbf16, #tpu.memory_space<vmem>>, %arg3: memref<10x256xbf16, #tpu.memory_space<vmem>>, %arg4: memref<1x256xf32, #tpu.memory_space<vmem>>, %arg5: memref<256x256xbf16, #tpu.memory_space<vmem>>, %arg6: memref<256x256xbf16, #tpu.memory_space<vmem>>, %arg7: memref<1x256xf32, #tpu.memory_space<vmem>>, %arg8: memref<256x256xbf16, #tpu.memory_space<vmem>>, %arg9: memref<1x256xf32, #tpu.memory_space<vmem>>, %arg10: memref<256x128xbf16, #tpu.memory_space<vmem>>, %arg11: memref<1x128xf32, #tpu.memory_space<vmem>>, %arg12: memref<64x128xf32, #tpu.memory_space<vmem>>) attributes {dimension_semantics = [#tpu.dimension_semantics<parallel>], iteration_bounds = array<i64: 2>, scalar_prefetch = 0 : i64, scratch_operands = 0 : i64, tpu.core_type = #tpu.core_type<tc>, window_params = [{transform_indices = @transform_0, window_bounds = array<i64: 64, 256>}, {transform_indices = @transform_1, window_bounds = array<i64: 64, 10>}, {pipeline_mode = #tpu.pipeline_mode<synchronous>, transform_indices = @transform_2, window_bounds = array<i64: 10, 256>}, {pipeline_mode = #tpu.pipeline_mode<synchronous>, transform_indices = @transform_3, window_bounds = array<i64: 1, 256>}, {pipeline_mode = #tpu.pipeline_mode<synchronous>, transform_indices = @transform_4, window_bounds = array<i64: 256, 256>}, {pipeline_mode = #tpu.pipeline_mode<synchronous>, transform_indices = @transform_5, window_bounds = array<i64: 256, 256>}, {pipeline_mode = #tpu.pipeline_mode<synchronous>, transform_indices = @transform_6, window_bounds = array<i64: 1, 256>}, {pipeline_mode = #tpu.pipeline_mode<synchronous>, transform_indices = @transform_7, window_bounds = array<i64: 256, 256>}, {pipeline_mode = #tpu.pipeline_mode<synchronous>, transform_indices = @transform_8, window_bounds = array<i64: 1, 256>}, {pipeline_mode = #tpu.pipeline_mode<synchronous>, transform_indices = @transform_9, window_bounds = array<i64: 256, 128>}, {pipeline_mode = #tpu.pipeline_mode<synchronous>, transform_indices = @transform_10, window_bounds = array<i64: 1, 128>}, {transform_indices = @transform_11, window_bounds = array<i64: 64, 128>}]} {
    %c0 = arith.constant 0 : index
    %c0_0 = arith.constant 0 : index
    %0 = vector.load %arg2[%c0, %c0_0] : memref<64x10xbf16, #tpu.memory_space<vmem>>, vector<64x10xbf16>
    %c0_1 = arith.constant 0 : index
    %c0_2 = arith.constant 0 : index
    %1 = vector.load %arg3[%c0_1, %c0_2] : memref<10x256xbf16, #tpu.memory_space<vmem>>, vector<10x256xbf16>
    %cst = arith.constant dense<0.000000e+00> : vector<64x256xf32>
    %2 = tpu.matmul %0, %1, %cst {dimension_numbers = #tpu.dot_dimension_numbers<[1], [0], [0], [1], [0, 0, 1, 1], [], []>} : vector<64x10xbf16>, vector<10x256xbf16>, vector<64x256xf32> -> vector<64x256xf32>
    %c0_3 = arith.constant 0 : index
    %c0_4 = arith.constant 0 : index
    %3 = vector.load %arg4[%c0_3, %c0_4] : memref<1x256xf32, #tpu.memory_space<vmem>>, vector<1x256xf32>
    %4 = vector.broadcast %3 : vector<1x256xf32> to vector<64x256xf32>
    %5 = arith.addf %2, %4 : vector<64x256xf32>
    %cst_5 = arith.constant 0.000000e+00 : f32
    %6 = vector.broadcast %cst_5 : f32 to vector<64x256xf32>
    %7 = arith.maximumf %5, %6 : vector<64x256xf32>
    %c0_6 = arith.constant 0 : index
    %c0_7 = arith.constant 0 : index
    %8 = vector.load %arg1[%c0_6, %c0_7] : memref<64x256xbf16, #tpu.memory_space<vmem>>, vector<64x256xbf16>
    %c0_8 = arith.constant 0 : index
    %c0_9 = arith.constant 0 : index
    %9 = vector.load %arg5[%c0_8, %c0_9] : memref<256x256xbf16, #tpu.memory_space<vmem>>, vector<256x256xbf16>
    %cst_10 = arith.constant dense<0.000000e+00> : vector<64x256xf32>
    %10 = tpu.matmul %8, %9, %cst_10 {dimension_numbers = #tpu.dot_dimension_numbers<[1], [0], [0], [1], [0, 0, 1, 1], [], []>} : vector<64x256xbf16>, vector<256x256xbf16>, vector<64x256xf32> -> vector<64x256xf32>
    %11 = arith.truncf %7 : vector<64x256xf32> to vector<64x256xbf16>
    %c0_11 = arith.constant 0 : index
    %c0_12 = arith.constant 0 : index
    %12 = vector.load %arg6[%c0_11, %c0_12] : memref<256x256xbf16, #tpu.memory_space<vmem>>, vector<256x256xbf16>
    %cst_13 = arith.constant dense<0.000000e+00> : vector<64x256xf32>
    %13 = tpu.matmul %11, %12, %cst_13 {dimension_numbers = #tpu.dot_dimension_numbers<[1], [0], [0], [1], [0, 0, 1, 1], [], []>} : vector<64x256xbf16>, vector<256x256xbf16>, vector<64x256xf32> -> vector<64x256xf32>
    %14 = arith.addf %10, %13 : vector<64x256xf32>
    %c0_14 = arith.constant 0 : index
    %c0_15 = arith.constant 0 : index
    %15 = vector.load %arg7[%c0_14, %c0_15] : memref<1x256xf32, #tpu.memory_space<vmem>>, vector<1x256xf32>
    %16 = vector.broadcast %15 : vector<1x256xf32> to vector<64x256xf32>
    %17 = arith.addf %14, %16 : vector<64x256xf32>
    %cst_16 = arith.constant 0.000000e+00 : f32
    %18 = vector.broadcast %cst_16 : f32 to vector<64x256xf32>
    %19 = arith.maximumf %17, %18 : vector<64x256xf32>
    %20 = arith.truncf %19 : vector<64x256xf32> to vector<64x256xbf16>
    %c0_17 = arith.constant 0 : index
    %c0_18 = arith.constant 0 : index
    %21 = vector.load %arg8[%c0_17, %c0_18] : memref<256x256xbf16, #tpu.memory_space<vmem>>, vector<256x256xbf16>
    %cst_19 = arith.constant dense<0.000000e+00> : vector<64x256xf32>
    %22 = tpu.matmul %20, %21, %cst_19 {dimension_numbers = #tpu.dot_dimension_numbers<[1], [0], [0], [1], [0, 0, 1, 1], [], []>} : vector<64x256xbf16>, vector<256x256xbf16>, vector<64x256xf32> -> vector<64x256xf32>
    %c0_20 = arith.constant 0 : index
    %c0_21 = arith.constant 0 : index
    %23 = vector.load %arg9[%c0_20, %c0_21] : memref<1x256xf32, #tpu.memory_space<vmem>>, vector<1x256xf32>
    %24 = vector.broadcast %23 : vector<1x256xf32> to vector<64x256xf32>
    %25 = arith.addf %22, %24 : vector<64x256xf32>
    %cst_22 = arith.constant 0.000000e+00 : f32
    %26 = vector.broadcast %cst_22 : f32 to vector<64x256xf32>
    %27 = arith.maximumf %25, %26 : vector<64x256xf32>
    %28 = arith.truncf %27 : vector<64x256xf32> to vector<64x256xbf16>
    %c0_23 = arith.constant 0 : index
    %c0_24 = arith.constant 0 : index
    %29 = vector.load %arg10[%c0_23, %c0_24] : memref<256x128xbf16, #tpu.memory_space<vmem>>, vector<256x128xbf16>
    %cst_25 = arith.constant dense<0.000000e+00> : vector<64x128xf32>
    %30 = tpu.matmul %28, %29, %cst_25 {dimension_numbers = #tpu.dot_dimension_numbers<[1], [0], [0], [1], [0, 0, 1, 1], [], []>} : vector<64x256xbf16>, vector<256x128xbf16>, vector<64x128xf32> -> vector<64x128xf32>
    %c0_26 = arith.constant 0 : index
    %c0_27 = arith.constant 0 : index
    %31 = vector.load %arg11[%c0_26, %c0_27] : memref<1x128xf32, #tpu.memory_space<vmem>>, vector<1x128xf32>
    %32 = vector.broadcast %31 : vector<1x128xf32> to vector<64x128xf32>
    %33 = arith.addf %30, %32 : vector<64x128xf32>
    %c0_28 = arith.constant 0 : index
    %c0_29 = arith.constant 0 : index
    %34 = vector.load %arg12[%c0_28, %c0_29] : memref<64x128xf32, #tpu.memory_space<vmem>>, vector<64x128xf32>
    tpu.vector_store %arg12[%c0_28, %c0_29], %33 {strides = array<i32>} : memref<64x128xf32, #tpu.memory_space<vmem>>, vector<64x128xf32>,
    return
  }
  func.func @transform_0(%arg0: i32) -> (i32, i32) {
    %c0_i32 = arith.constant 0 : i32
    %c0_i32_0 = arith.constant 0 : i32
    return %arg0, %c0_i32 : i32, i32
  }
  func.func @transform_1(%arg0: i32) -> (i32, i32) {
    %c0_i32 = arith.constant 0 : i32
    %c0_i32_0 = arith.constant 0 : i32
    return %arg0, %c0_i32 : i32, i32
  }
  func.func @transform_2(%arg0: i32) -> (i32, i32) {
    %c0_i32 = arith.constant 0 : i32
    %c0_i32_0 = arith.constant 0 : i32
    %c0_i32_1 = arith.constant 0 : i32
    return %c0_i32, %c0_i32_0 : i32, i32
  }
  func.func @transform_3(%arg0: i32) -> (i32, i32) {
    %c0_i32 = arith.constant 0 : i32
    %c0_i32_0 = arith.constant 0 : i32
    %c0_i32_1 = arith.constant 0 : i32
    return %c0_i32, %c0_i32_0 : i32, i32
  }
  func.func @transform_4(%arg0: i32) -> (i32, i32) {
    %c0_i32 = arith.constant 0 : i32
    %c0_i32_0 = arith.constant 0 : i32
    %c0_i32_1 = arith.constant 0 : i32
    return %c0_i32, %c0_i32_0 : i32, i32
  }
  func.func @transform_5(%arg0: i32) -> (i32, i32) {
    %c0_i32 = arith.constant 0 : i32
    %c0_i32_0 = arith.constant 0 : i32
    %c0_i32_1 = arith.constant 0 : i32
    return %c0_i32, %c0_i32_0 : i32, i32
  }
  func.func @transform_6(%arg0: i32) -> (i32, i32) {
    %c0_i32 = arith.constant 0 : i32
    %c0_i32_0 = arith.constant 0 : i32
    %c0_i32_1 = arith.constant 0 : i32
    return %c0_i32, %c0_i32_0 : i32, i32
  }
  func.func @transform_7(%arg0: i32) -> (i32, i32) {
    %c0_i32 = arith.constant 0 : i32
    %c0_i32_0 = arith.constant 0 : i32
    %c0_i32_1 = arith.constant 0 : i32
    return %c0_i32, %c0_i32_0 : i32, i32
  }
  func.func @transform_8(%arg0: i32) -> (i32, i32) {
    %c0_i32 = arith.constant 0 : i32
    %c0_i32_0 = arith.constant 0 : i32
    %c0_i32_1 = arith.constant 0 : i32
    return %c0_i32, %c0_i32_0 : i32, i32
  }
  func.func @transform_9(%arg0: i32) -> (i32, i32) {
    %c0_i32 = arith.constant 0 : i32
    %c0_i32_0 = arith.constant 0 : i32
    %c0_i32_1 = arith.constant 0 : i32
    return %c0_i32, %c0_i32_0 : i32, i32
  }
  func.func @transform_10(%arg0: i32) -> (i32, i32) {
    %c0_i32 = arith.constant 0 : i32
    %c0_i32_0 = arith.constant 0 : i32
    %c0_i32_1 = arith.constant 0 : i32
    return %c0_i32, %c0_i32_0 : i32, i32
  }
  func.func @transform_11(%arg0: i32) -> (i32, i32) {
    %c0_i32 = arith.constant 0 : i32
    %c0_i32_0 = arith.constant 0 : i32
    return %arg0, %c0_i32 : i32, i32
  }
}

module attributes {stable_mosaic.version = 11 : i64} {
  func.func @_discriminator_kernel(%arg0: i32, %arg1: memref<64x256xbf16, #tpu.memory_space<vmem>>, %arg2: memref<64x10xbf16, #tpu.memory_space<vmem>>, %arg3: memref<10x256xbf16, #tpu.memory_space<vmem>>, %arg4: memref<1x256xf32, #tpu.memory_space<vmem>>, %arg5: memref<256x256xbf16, #tpu.memory_space<vmem>>, %arg6: memref<256x256xbf16, #tpu.memory_space<vmem>>, %arg7: memref<1x256xf32, #tpu.memory_space<vmem>>, %arg8: memref<256x256xbf16, #tpu.memory_space<vmem>>, %arg9: memref<1x256xf32, #tpu.memory_space<vmem>>, %arg10: memref<256x128xbf16, #tpu.memory_space<vmem>>, %arg11: memref<1x128xf32, #tpu.memory_space<vmem>>, %arg12: memref<64x128xf32, #tpu.memory_space<vmem>>) attributes {dimension_semantics = [#tpu.dimension_semantics<parallel>], iteration_bounds = array<i64: 2>, scalar_prefetch = 0 : i64, scratch_operands = 0 : i64, tpu.core_type = #tpu.core_type<tc>, window_params = [{transform_indices = @transform_0, window_bounds = array<i64: 64, 256>}, {transform_indices = @transform_1, window_bounds = array<i64: 64, 10>}, {pipeline_mode = #tpu.pipeline_mode<synchronous>, transform_indices = @transform_2, window_bounds = array<i64: 10, 256>}, {pipeline_mode = #tpu.pipeline_mode<synchronous>, transform_indices = @transform_3, window_bounds = array<i64: 1, 256>}, {pipeline_mode = #tpu.pipeline_mode<synchronous>, transform_indices = @transform_4, window_bounds = array<i64: 256, 256>}, {pipeline_mode = #tpu.pipeline_mode<synchronous>, transform_indices = @transform_5, window_bounds = array<i64: 256, 256>}, {pipeline_mode = #tpu.pipeline_mode<synchronous>, transform_indices = @transform_6, window_bounds = array<i64: 1, 256>}, {pipeline_mode = #tpu.pipeline_mode<synchronous>, transform_indices = @transform_7, window_bounds = array<i64: 256, 256>}, {pipeline_mode = #tpu.pipeline_mode<synchronous>, transform_indices = @transform_8, window_bounds = array<i64: 1, 256>}, {pipeline_mode = #tpu.pipeline_mode<synchronous>, transform_indices = @transform_9, window_bounds = array<i64: 256, 128>}, {pipeline_mode = #tpu.pipeline_mode<synchronous>, transform_indices = @transform_10, window_bounds = array<i64: 1, 128>}, {transform_indices = @transform_11, window_bounds = array<i64: 64, 128>}]} {
    %c0 = arith.constant 0 : index
    %c0_0 = arith.constant 0 : index
    %0 = vector.load %arg2[%c0, %c0_0] : memref<64x10xbf16, #tpu.memory_space<vmem>>, vector<64x10xbf16>
    %c0_1 = arith.constant 0 : index
    %c0_2 = arith.constant 0 : index
    %1 = vector.load %arg3[%c0_1, %c0_2] : memref<10x256xbf16, #tpu.memory_space<vmem>>, vector<10x256xbf16>
    %cst = arith.constant dense<0.000000e+00> : vector<64x256xf32>
    %2 = tpu.matmul %0, %1, %cst {dimension_numbers = #tpu.dot_dimension_numbers<[1], [0], [0], [1], [0, 0, 1, 1], [], []>} : vector<64x10xbf16>, vector<10x256xbf16>, vector<64x256xf32> -> vector<64x256xf32>
    %c0_3 = arith.constant 0 : index
    %c0_4 = arith.constant 0 : index
    %3 = vector.load %arg4[%c0_3, %c0_4] : memref<1x256xf32, #tpu.memory_space<vmem>>, vector<1x256xf32>
    %4 = vector.broadcast %3 : vector<1x256xf32> to vector<64x256xf32>
    %5 = arith.addf %2, %4 : vector<64x256xf32>
    %cst_5 = arith.constant 0.000000e+00 : f32
    %6 = vector.broadcast %cst_5 : f32 to vector<64x256xf32>
    %7 = arith.maximumf %5, %6 : vector<64x256xf32>
    %c0_6 = arith.constant 0 : index
    %c0_7 = arith.constant 0 : index
    %8 = vector.load %arg1[%c0_6, %c0_7] : memref<64x256xbf16, #tpu.memory_space<vmem>>, vector<64x256xbf16>
    %c0_8 = arith.constant 0 : index
    %c0_9 = arith.constant 0 : index
    %9 = vector.load %arg5[%c0_8, %c0_9] : memref<256x256xbf16, #tpu.memory_space<vmem>>, vector<256x256xbf16>
    %cst_10 = arith.constant dense<0.000000e+00> : vector<64x256xf32>
    %10 = tpu.matmul %8, %9, %cst_10 {dimension_numbers = #tpu.dot_dimension_numbers<[1], [0], [0], [1], [0, 0, 1, 1], [], []>} : vector<64x256xbf16>, vector<256x256xbf16>, vector<64x256xf32> -> vector<64x256xf32>
    %11 = arith.truncf %7 : vector<64x256xf32> to vector<64x256xbf16>
    %c0_11 = arith.constant 0 : index
    %c0_12 = arith.constant 0 : index
    %12 = vector.load %arg6[%c0_11, %c0_12] : memref<256x256xbf16, #tpu.memory_space<vmem>>, vector<256x256xbf16>
    %cst_13 = arith.constant dense<0.000000e+00> : vector<64x256xf32>
    %13 = tpu.matmul %11, %12, %cst_13 {dimension_numbers = #tpu.dot_dimension_numbers<[1], [0], [0], [1], [0, 0, 1, 1], [], []>} : vector<64x256xbf16>, vector<256x256xbf16>, vector<64x256xf32> -> vector<64x256xf32>
    %14 = arith.addf %10, %13 : vector<64x256xf32>
    %c0_14 = arith.constant 0 : index
    %c0_15 = arith.constant 0 : index
    %15 = vector.load %arg7[%c0_14, %c0_15] : memref<1x256xf32, #tpu.memory_space<vmem>>, vector<1x256xf32>
    %16 = vector.broadcast %15 : vector<1x256xf32> to vector<64x256xf32>
    %17 = arith.addf %14, %16 : vector<64x256xf32>
    %cst_16 = arith.constant 0.000000e+00 : f32
    %18 = vector.broadcast %cst_16 : f32 to vector<64x256xf32>
    %19 = arith.maximumf %17, %18 : vector<64x256xf32>
    %20 = arith.truncf %19 : vector<64x256xf32> to vector<64x256xbf16>
    %c0_17 = arith.constant 0 : index
    %c0_18 = arith.constant 0 : index
    %21 = vector.load %arg8[%c0_17, %c0_18] : memref<256x256xbf16, #tpu.memory_space<vmem>>, vector<256x256xbf16>
    %cst_19 = arith.constant dense<0.000000e+00> : vector<64x256xf32>
    %22 = tpu.matmul %20, %21, %cst_19 {dimension_numbers = #tpu.dot_dimension_numbers<[1], [0], [0], [1], [0, 0, 1, 1], [], []>} : vector<64x256xbf16>, vector<256x256xbf16>, vector<64x256xf32> -> vector<64x256xf32>
    %c0_20 = arith.constant 0 : index
    %c0_21 = arith.constant 0 : index
    %23 = vector.load %arg9[%c0_20, %c0_21] : memref<1x256xf32, #tpu.memory_space<vmem>>, vector<1x256xf32>
    %24 = vector.broadcast %23 : vector<1x256xf32> to vector<64x256xf32>
    %25 = arith.addf %22, %24 : vector<64x256xf32>
    %cst_22 = arith.constant 0.000000e+00 : f32
    %26 = vector.broadcast %cst_22 : f32 to vector<64x256xf32>
    %27 = arith.maximumf %25, %26 : vector<64x256xf32>
    %28 = arith.truncf %27 : vector<64x256xf32> to vector<64x256xbf16>
    %c0_23 = arith.constant 0 : index
    %c0_24 = arith.constant 0 : index
    %29 = vector.load %arg10[%c0_23, %c0_24] : memref<256x128xbf16, #tpu.memory_space<vmem>>, vector<256x128xbf16>
    %cst_25 = arith.constant dense<0.000000e+00> : vector<64x128xf32>
    %30 = tpu.matmul %28, %29, %cst_25 {dimension_numbers = #tpu.dot_dimension_numbers<[1], [0], [0], [1], [0, 0, 1, 1], [], []>} : vector<64x256xbf16>, vector<256x128xbf16>, vector<64x128xf32> -> vector<64x128xf32>
    %c0_26 = arith.constant 0 : index
    %c0_27 = arith.constant 0 : index
    %31 = vector.load %arg11[%c0_26, %c0_27] : memref<1x128xf32, #tpu.memory_space<vmem>>, vector<1x128xf32>
    %32 = vector.broadcast %31 : vector<1x128xf32> to vector<64x128xf32>
    %33 = arith.addf %30, %32 : vector<64x128xf32>
    %c0_28 = arith.constant 0 : index
    %c0_29 = arith.constant 0 : index
    %34 = vector.load %arg12[%c0_28, %c0_29] : memref<64x128xf32, #tpu.memory_space<vmem>>, vector<64x128xf32>
    tpu.vector_store %arg12[%c0_28, %c0_29], %33 {strides = array<i32>} : memref<64x128xf32, #tpu.memory_space<vmem>>, vector<64x128xf32>,
    return
  }
  func.func @transform_0(%arg0: i32) -> (i32, i32) {
    %c0_i32 = arith.constant 0 : i32
    %c0_i32_0 = arith.constant 0 : i32
    return %arg0, %c0_i32 : i32, i32
  }
  func.func @transform_1(%arg0: i32) -> (i32, i32) {
    %c0_i32 = arith.constant 0 : i32
    %c0_i32_0 = arith.constant 0 : i32
    return %arg0, %c0_i32 : i32, i32
  }
  func.func @transform_2(%arg0: i32) -> (i32, i32) {
    %c0_i32 = arith.constant 0 : i32
    %c0_i32_0 = arith.constant 0 : i32
    %c0_i32_1 = arith.constant 0 : i32
    return %c0_i32, %c0_i32_0 : i32, i32
  }
  func.func @transform_3(%arg0: i32) -> (i32, i32) {
    %c0_i32 = arith.constant 0 : i32
    %c0_i32_0 = arith.constant 0 : i32
    %c0_i32_1 = arith.constant 0 : i32
    return %c0_i32, %c0_i32_0 : i32, i32
  }
  func.func @transform_4(%arg0: i32) -> (i32, i32) {
    %c0_i32 = arith.constant 0 : i32
    %c0_i32_0 = arith.constant 0 : i32
    %c0_i32_1 = arith.constant 0 : i32
    return %c0_i32, %c0_i32_0 : i32, i32
  }
  func.func @transform_5(%arg0: i32) -> (i32, i32) {
    %c0_i32 = arith.constant 0 : i32
    %c0_i32_0 = arith.constant 0 : i32
    %c0_i32_1 = arith.constant 0 : i32
    return %c0_i32, %c0_i32_0 : i32, i32
  }
  func.func @transform_6(%arg0: i32) -> (i32, i32) {
    %c0_i32 = arith.constant 0 : i32
    %c0_i32_0 = arith.constant 0 : i32
    %c0_i32_1 = arith.constant 0 : i32
    return %c0_i32, %c0_i32_0 : i32, i32
  }
  func.func @transform_7(%arg0: i32) -> (i32, i32) {
    %c0_i32 = arith.constant 0 : i32
    %c0_i32_0 = arith.constant 0 : i32
    %c0_i32_1 = arith.constant 0 : i32
    return %c0_i32, %c0_i32_0 : i32, i32
  }
  func.func @transform_8(%arg0: i32) -> (i32, i32) {
    %c0_i32 = arith.constant 0 : i32
    %c0_i32_0 = arith.constant 0 : i32
    %c0_i32_1 = arith.constant 0 : i32
    return %c0_i32, %c0_i32_0 : i32, i32
  }
  func.func @transform_9(%arg0: i32) -> (i32, i32) {
    %c0_i32 = arith.constant 0 : i32
    %c0_i32_0 = arith.constant 0 : i32
    %c0_i32_1 = arith.constant 0 : i32
    return %c0_i32, %c0_i32_0 : i32, i32
  }
  func.func @transform_10(%arg0: i32) -> (i32, i32) {
    %c0_i32 = arith.constant 0 : i32
    %c0_i32_0 = arith.constant 0 : i32
    %c0_i32_1 = arith.constant 0 : i32
    return %c0_i32, %c0_i32_0 : i32, i32
  }
  func.func @transform_11(%arg0: i32) -> (i32, i32) {
    %c0_i32 = arith.constant 0 : i32
    %c0_i32_0 = arith.constant 0 : i32
    return %arg0, %c0_i32 : i32, i32
  }
}

</mosaic_0001>

<bundles_post_ra>
// kernel: tpu_custom_call.1
= control target key start
LH: loop header
LB: loop body
LE: loop exit
PB: predicated region body
PF: predicated region fallthrough
CT: control target
= control target key end

     0   :  { %s3108_s0 = inlined_call_operand.hbm [shape: bf16[128,256], index: 0, kind: input, shape index: {}]   ;;  %s3109_s1 = inlined_call_operand.vmem [shape: bf16[128,10], index: 1, kind: input, shape index: {}]   ;;  %s3110_s2 = inlined_call_operand.vmem [shape: bf16[10,256], index: 2, kind: input, shape index: {}]   ;;  %s3111_s3 = inlined_call_operand.vmem [shape: f32[1,256], index: 3, kind: input, shape index: {}]   ;;  %s3112_s4 = inlined_call_operand.hbm [shape: bf16[256,256], index: 4, kind: input, shape index: {}]   ;;  %s3113_s5 = inlined_call_operand.hbm [shape: bf16[256,256], index: 5, kind: input, shape index: {}]   ;;  %s3114_s6 = inlined_call_operand.vmem [shape: f32[1,256], index: 6, kind: input, shape index: {}]   ;;  %s3115_s7 = inlined_call_operand.hbm [shape: bf16[256,256], index: 7, kind: input, shape index: {}]   ;;  %s3116_s8 = inlined_call_operand.vmem [shape: f32[1,256], index: 8, kind: input, shape index: {}]   ;;  %s3117_s9 = inlined_call_operand.hbm [shape: bf16[256,128], index: 9, kind: input, shape index: {}]   ;;  %s3118_s10 = inlined_call_operand.vmem [shape: f32[1,128], index: 10, kind: input, shape index: {}]   ;;  %s3119_s11 = inlined_call_operand.hbm [shape: f32[128,128], index: 11, kind: output, shape index: {}]  }
   0x1   :  { %3126 = sst [smem:[#allocation18_spill]] %s3116_s8 }
   0x2   :  { %3127 = sst [smem:[#allocation19_spill]] %s3118_s10 }
   0x3   :  { %3128 = sst [smem:[#allocation20_spill]] %s3119_s11 }
   0x4   :  { %16 = vsyncpa [#allocation3], 0 }
   0x5   :  { %18 = vsyncpa [#allocation3 + $0x1], 0 }
   0x6   :  { %19 = vsyncpa [#allocation6], 0 }
   0x7   :  { %20 = vsyncpa [#allocation9], 0 }
   0x8   :  { %21 = vsyncpa [#allocation4], 0 }
   0x9   :  { %23 = vsyncpa [#allocation4 + $0x1], 0  ;;  %s2712_s17 = smov 0   ;;  %s2714_s18 = smov 0  }
   0xa   :  { %s2716_s19 = smov 0   ;;  %s2718_s20 = smov 0  }
   0xb LB: > { %3129 = sst [smem:[#allocation16_spill]] %s2625_s17  ;;  %s2733_s21 = sadd.s32 4294967295, %s2637_s20   ;;  %s2637_s20 = sphi %s2718_s20, %s3156_s20   ;;  %s2633_s19 = sphi %s2716_s19, %s3155_s19   ;;  %s2629_s18 = sphi %s2714_s18, %s3154_s18   ;;  %s2625_s17 = sphi %s2712_s17, %s3153_s17  }
   0xc   : > { %s1932_s22 = sadd.s32 4294967294, %s2637_s20   ;;  %p49_p0 = scmp.ne.s32.totalorder %s2629_s18, %s2625_s17 }
   0xd   : > { %p3121_p1 = scmp.eq.s32.totalorder %s2733_s21, 0  ;;  %p294_p3 = scmp.eq.s32.totalorder %s1932_s22, 1 }
   0xe   : > { %p1933_p5 = scmp.ge.s32.totalorder %s2637_s20, 1  ;;  %p301_p7 = scmp.lt.s32.totalorder %s2637_s20, 3 }
   0xf   : > { %p2742_p4 = por %p3121_p1, %p49_p0  ;;  %p2747_p6 = por %p294_p3, %p49_p0 }
  0x10   : > { %p2752_p8 = pnand %p1933_p5, %p301_p7  ;;  %s2639_s26 = smov [#allocation5]  }
  0x11   : > { %s3130_s23 = scalar_select %p2742_p4, 1, 0 }
  0x12   : > { %s3131_s24 = scalar_select %p2747_p6, 1, 0 }
  0x13   : > { %s3133_s25 = scalar_select %p2752_p8, 1, 0 }
  0x14   : > { %3132 = sst [smem:[#allocation17_spill]] %s3131_s24  ;;  %s319_s27 = sshll.u32 %s2639_s26, 4  ;;  %s2756_s27 = int_to_ptr.vmem [resolvable:$true] %s319_s27 }
  0x15   : > { %p2168_p9 = pneg %p2752_p8  ;;  %s2640_s29 = smov [#allocation8]  }
  0x16   : > { %s348_s30 = sshll.u32 %s2640_s29, 4  ;;  %s2641_s12 = smov [#allocation7]   ;;  %s2767_s30 = int_to_ptr.vmem [resolvable:$true] %s348_s30 }
  0x17   : > { %p2763_p11 = pnand %p2168_p9, %p3121_p1  ;;  %s2769_s13 = sshll.u32 %s2641_s12, 4  ;;  %s333_s13 = int_to_ptr.vmem [resolvable:$true] %s2769_s13 }
  0x18   : > { %s2421_s16 = scalar_lea.hbm %s3112_s4, 4096 }
  0x19   : > { %p2422_p12 = scmp.ne.s32.totalorder %s3112_s4, %s2421_s16  ;;  %p2779_p13 = pneg %p2763_p11 }
  0x1a   : > { %p2428_p5 = scmp.lt.u32.totalorder %s2421_s16, %s3112_s4 }
  0x1b   : > { %p2424_p0 = pnand %p2779_p13, %p2422_p12 }
  0x1d   : > { %p2425_p3 = pneg %p2424_p0 }
  0x1f   : > { %p2430_p7 = pnand %p2428_p5, %p2425_p3 }
  0x21   : > { %2433 = shalt.err (!%p2430_p7)
}
  0x22   : > { %s2434_s14 = scalar_lea.vmem %s2756_s27, 4096  ;;  %p2442_p2 = scmp.lt.s32.totalorder %s2756_s27, %s2756_s27 }
  0x23   : > { %p2435_p9 = scmp.ne.s32.totalorder %s2756_s27, %s2434_s14  ;;  %p2443_p6 = scmp.lt.s32.totalorder %s2434_s14, %s2434_s14 }
  0x25   : > { %p2437_p10 = pnand %p2435_p9, %p2779_p13  ;;  %p2444_p12 = por %p2443_p6, %p2442_p2 }
  0x27   : > { %p2438_p1 = pneg %p2437_p10 }
  0x29   : > { %p2445_p0 = pnand %p2444_p12, %p2438_p1 }
  0x2b   : > { %2448 = shalt.err (!%p2445_p0)
}
  0x2c   : > { %s2642_s15 = smov 128   ;;  %s2643_s16 = smov 8  }
  0x2d   : > { %2171 = dma.hbm_to_vmem [thread:$0]  (!%p2763_p11), %s3112_s4, 4096, %s2756_s27, [#allocation6], %s2642_s15, %s2642_s15, %s2643_s16  }
  0x2e   : > { %s2449_s14 = scalar_lea.hbm %s3115_s7, 4096 }
  0x2f   : > { %p2450_p1 = scmp.ne.s32.totalorder %s3115_s7, %s2449_s14  ;;  %p2456_p10 = scmp.lt.u32.totalorder %s2449_s14, %s3115_s7 }
  0x31   : > { %p2452_p2 = pnand %p2450_p1, %p2779_p13 }
  0x33   : > { %p2453_p6 = pneg %p2452_p2 }
  0x35   : > { %p2458_p3 = pnand %p2456_p10, %p2453_p6 }
  0x37   : > { %2461 = shalt.err (!%p2458_p3)
}
  0x38   : > { %s2462_s27 = scalar_lea.vmem %s2767_s30, 4096  ;;  %p2470_p12 = scmp.lt.s32.totalorder %s2767_s30, %s2767_s30 }
  0x39   : > { %p2463_p5 = scmp.ne.s32.totalorder %s2767_s30, %s2462_s27  ;;  %p2471_p0 = scmp.lt.s32.totalorder %s2462_s27, %s2462_s27 }
  0x3b   : > { %p2465_p7 = pnand %p2463_p5, %p2779_p13  ;;  %p2472_p1 = por %p2471_p0, %p2470_p12 }
  0x3d   : > { %p2466_p9 = pneg %p2465_p7 }
  0x3f   : > { %p2473_p2 = pnand %p2472_p1, %p2466_p9 }
  0x41   : > { %2476 = shalt.err (!%p2473_p2)
}
  0x42   : > { %2177 = dma.hbm_to_vmem [thread:$0]  (!%p2763_p11), %s3115_s7, 4096, %s2767_s30, [#allocation9], %s2642_s15, %s2642_s15, %s2643_s16  }
  0x43   : > { %s2477_s22 = scalar_lea.hbm %s3113_s5, 4096 }
  0x44   : > { %p2478_p6 = scmp.ne.s32.totalorder %s3113_s5, %s2477_s22  ;;  %p2484_p5 = scmp.lt.u32.totalorder %s2477_s22, %s3113_s5 }
  0x46   : > { %p2480_p10 = pnand %p2478_p6, %p2779_p13 }
  0x48   : > { %p2481_p3 = pneg %p2480_p10 }
  0x4a   : > { %p2486_p7 = pnand %p2484_p5, %p2481_p3 }
  0x4c   : > { %2489 = shalt.err (!%p2486_p7)
}
  0x4d   : > { %s2490_s27 = scalar_lea.vmem %s333_s13, 4096  ;;  %p2498_p1 = scmp.lt.s32.totalorder %s333_s13, %s333_s13 }
  0x4e   : > { %p2491_p9 = scmp.ne.s32.totalorder %s333_s13, %s2490_s27  ;;  %p2499_p2 = scmp.lt.s32.totalorder %s2490_s27, %s2490_s27 }
  0x50   : > { %p2493_p12 = pnand %p2491_p9, %p2779_p13  ;;  %p2500_p4 = por %p2499_p2, %p2498_p1 }
  0x52   : > { %p2494_p0 = pneg %p2493_p12 }
  0x54   : > { %p2501_p8 = pnand %p2500_p4, %p2494_p0 }
  0x56   : > { %2504 = shalt.err (!%p2501_p8)
}
  0x57   : > { %2174 = dma.hbm_to_vmem [thread:$0]  (!%p2763_p11), %s3113_s5, 4096, %s333_s13, [#allocation6], %s2642_s15, %s2642_s15, %s2643_s16  }
  0x58   : > { %s2644_s10 = smov [#allocation10]   ;;  %s2505_s26 = scalar_lea.hbm %s3117_s9, 2048 }
  0x59   : > { %s364_s11 = sshll.u32 %s2644_s10, 4  ;;  %p2506_p4 = scmp.ne.s32.totalorder %s3117_s9, %s2505_s26  ;;  %s365_s11 = int_to_ptr.vmem [resolvable:$true] %s364_s11 }
  0x5a   : > { %p2512_p10 = scmp.lt.u32.totalorder %s2505_s26, %s3117_s9 }
  0x5b   : > { %p2508_p8 = pnand %p2506_p4, %p2779_p13 }
  0x5d   : > { %p2509_p6 = pneg %p2508_p8 }
  0x5f   : > { %p2514_p3 = pnand %p2512_p10, %p2509_p6 }
  0x61   : > { %2517 = shalt.err (!%p2514_p3)
}
  0x62   : > { %s2518_s13 = scalar_lea.vmem %s365_s11, 2048  ;;  %p2526_p12 = scmp.lt.s32.totalorder %s365_s11, %s365_s11 }
  0x63   : > { %p2519_p5 = scmp.ne.s32.totalorder %s365_s11, %s2518_s13  ;;  %p2527_p0 = scmp.lt.s32.totalorder %s2518_s13, %s2518_s13 }
  0x65   : > { %p2521_p7 = pnand %p2519_p5, %p2779_p13  ;;  %p2528_p1 = por %p2527_p0, %p2526_p12 }
  0x67   : > { %p2522_p9 = pneg %p2521_p7 }
  0x69   : > { %p2529_p2 = pnand %p2528_p1, %p2522_p9 }
  0x6b   : > { %2532 = shalt.err (!%p2529_p2)
}
  0x6c   : > { %s2645_s30 = smov 64   ;;  %s2646_s24 = smov 4  }
  0x6d   : > { %2180 = dma.hbm_to_vmem [thread:$0]  (!%p2763_p11), %s3117_s9, 2048, %s365_s11, [#allocation9], %s2645_s30, %s2645_s30, %s2646_s24  }
  0x6e   : > { %s2870_s17 = sadd.s32 1, %s2637_s20   ;;  %s36_s26 = sadd.s32 1, %s2633_s19 }
  0x6f   : > { %s33_s22 = ssub.s32 %s2637_s20, %s2870_s17  ;;  %p43_p4 = scmp.ne.s32.totalorder %s2633_s19, %s2629_s18 }
  0x70   : > { %p34_p13 = scmp.eq.s32.totalorder %s33_s22, 0  ;;  %p44_p8 = scmp.eq.s32.totalorder %s2637_s20, 0 }
  0x71   : > { %p3136_p10 = scmp.eq.s32.totalorder %s2733_s21, 1  ;;  %p2193_p5 = scmp.lt.s32.totalorder %s2637_s20, 2 }
  0x72   : > { %s2879_s29 = scalar_select %p34_p13, %s2633_s19, %s36_s26  }
  0x73   : > { %p45_p6 = por %p44_p8, %p43_p4  ;;  %p2883_p3 = por %p3136_p10, %p43_p4 }
  0x74   : > { %s381_s28 = sand.u32 1, %s2633_s19   ;;  %s2090_s11 = sshll.u32 %s2637_s20, 10 }
  0x75   : > { %s1939_s14 = sshll.u32 %s381_s28, 6  ;;  %s2893_s30 = scalar_lea.hbm %s3108_s0, %s2090_s11 }
  0x76   : > { %s385_s24 = scalar_lea.vmem [#allocation2], %s1939_s14  ;;  %p2897_p11 = pnand %p2193_p5, %p45_p6 }
  0x77   : > { %s393_s8 = sshll.u32 %s385_s24, 4  ;;  %s2901_s22 = scalar_lea.sflag [#allocation3], %s381_s28  ;;  %s2895_s8 = int_to_ptr.vmem [resolvable:$true] %s393_s8 }
  0x78   : > { %s2533_s26 = scalar_lea.hbm %s2893_s30, 1024  ;;  %p2535_p9 = pneg %p2897_p11 }
  0x79   : > { %p2534_p7 = scmp.ne.s32.totalorder %s2893_s30, %s2533_s26  ;;  %s2538_s27 = scalar_lea.hbm %s3108_s0, 2048 }
  0x7a   : > { %p2539_p1 = scmp.lt.u32.totalorder %s2893_s30, %s3108_s0  ;;  %p2540_p2 = scmp.lt.u32.totalorder %s2538_s27, %s2533_s26 }
  0x7b   : > { %p2536_p12 = pnand %p2535_p9, %p2534_p7  ;;  %p2542_p4 = scmp.lt.u32.totalorder %s2533_s26, %s2893_s30 }
  0x7c   : > { %p2541_p13 = por %p2540_p2, %p2539_p1 }
  0x7d   : > { %p2537_p0 = pneg %p2536_p12 }
  0x7e   : > { %p2543_p8 = por %p2542_p4, %p2541_p13 }
  0x80   : > { %p2544_p6 = pnand %p2543_p8, %p2537_p0 }
  0x82   : > { %2547 = shalt.err (!%p2544_p6)
}
  0x83   : > { %s2548_s28 = scalar_lea.vmem %s2895_s8, 1024  ;;  %s2647_s14 = smov [#allocation2]  }
  0x84   : > { %p2549_p10 = scmp.ne.s32.totalorder %s2895_s8, %s2548_s28  ;;  %s2553_s11 = sshll.u32 %s2647_s14, 4  ;;  %s2554_s11 = int_to_ptr.vmem [resolvable:$false] %s2553_s11 }
  0x85   : > { %s2555_s13 = scalar_lea.vmem %s2554_s11, 2048  ;;  %p2556_p12 = scmp.lt.s32.totalorder %s2895_s8, %s2554_s11 }
  0x86   : > { %p2551_p5 = pnand %p2549_p10, %p2535_p9  ;;  %p2557_p1 = scmp.lt.s32.totalorder %s2555_s13, %s2548_s28 }
  0x88   : > { %p2552_p7 = pneg %p2551_p5  ;;  %p2558_p2 = por %p2557_p1, %p2556_p12 }
  0x8a   : > { %p2559_p13 = pnand %p2558_p2, %p2552_p7 }
  0x8c   : > { %2562 = shalt.err (!%p2559_p13)
}
  0x8d   : > { %2184 = dma.hbm_to_vmem [thread:$0]  (!%p2897_p11), %s2893_s30, 1024, %s2895_s8, %s2901_s22, %s2642_s15, %s2642_s15, %s2643_s16  }
  0x8e   : > { %p3139_p9 = scmp.ne.s32.totalorder %s3133_s25, 0 }
  0x8f   : > { %s2935_s26 = sand.u32 (!%p3139_p9), 1, %s2629_s18   ;;  %p3140_p0 = scmp.ne.s32.totalorder (!%p3139_p9), %s3130_s23, 0 }
  0x90   : > { %414 = sbr.rel (%p3139_p9) target bundleno = 1154 (0x482), region = 64  ;;  %s1944_s27 = sshll.u32 (!%p3139_p9), %s2935_s26, 6 }
  0x91   : > { %s417_s24 = scalar_lea.sflag (!%p3139_p9), [#allocation3], %s2935_s26  ;;  %s2941_s10 = scalar_lea.vmem (!%p3139_p9), [#allocation2], %s1944_s27 }
  0x97   : > { %2608 = dma.done.wait (%p3140_p0), %s417_s24, 1024  }
  0x98   : > { %2610 = vsyncadd (%p3140_p0), %s417_s24, 4294966272  ;;  %p3141_p11 = scmp.eq.s32.totalorder %s2733_s21, 0 }
  0x9a   : > { %2612 = dma.done.wait (%p3141_p11), [#allocation6], 8192   ;;  %p3142_p4 = pmov %p3141_p11 }
  0x9c   : > { %2614 = vsyncadd (%p3142_p4), [#allocation6], 4294959104  ;;  %p3143_p8 = pmov %p3142_p4 }
  0x9d   : > { %p3144_p6 = pmov %p3142_p4 }
  0x9e   : > { %2616 = dma.done.wait (%p3143_p8), [#allocation9], 6144  }
  0x9f   : > { %2618 = vsyncadd (%p3144_p6), [#allocation9], 4294961152  ;;  %s1950_s25 = sshll.u32 %s2733_s21, 3  ;;  %v2648_v0 = vmov 0   ;;  %vm552_vm0 = vcmask 1044480   ;;  %vm539_vm1 = vcmask 80896   ;;  %v501_v50 = vlaneseq }
  0xa0   : > { %591 = vmatprep.mubr.bf16.mxu0 %v2648_v0  ;;  %p482_p10 = scmp.lt.s32.totalorder %s1950_s25, 15  ;;  %v2242_v1 = vld [vmem:[%s3110_s2 + $0x4] ss:$8 sps:$4 sm:$0x1f]   ;;  %v2251_v6 = vld [vmem:[#allocation7] ss:$8 sps:$4 sm:$0xff]  }
  0xa1   : > { %v2244_v2 = vld [vmem:[%s3110_s2] ss:$8 sps:$4 sm:$0x1f]   ;;  %1958 = vmatprep.subr.msk.bf16.mxu0 %vm552_vm0, %v2242_v1  ;;  %v2249_v5 = vld [vmem:[#allocation7 + $0x4] ss:$8 sps:$4 sm:$0xff]   ;;  %v502_v53 = vshrl.u32 %v501_v50, 7 }
  0xa2   : > { %s3158_s25 = smov (!%p482_p10, %s1950_s25), 15  ;;  %v554_v3 = vsel %vm552_vm0, %v2244_v2, 0  ;;  %v2252_v7 = vld [vmem:[#allocation7 + $0x14] ss:$8 sps:$4 sm:$0xff]   ;;  %888 = vmatprep.subr.bf16.mxu1 %v2249_v5  ;;  %v2254_v8 = vld [vmem:[#allocation7 + $0x10] ss:$8 sps:$4 sm:$0xff]  }
  0xa3   : > { %s1951_s23 = sshll.u32 %s3158_s25, 2  ;;  %560 = vmatpush1.bf16.msra.mxu0 %v554_v3  ;;  %889 = vmatpush1.bf16.msra.mxu1 %v2251_v6  ;;  %v2255_v9 = vld [vmem:[#allocation7 + $0x24] ss:$8 sps:$4 sm:$0xff]   ;;  %v2257_v11 = vld [vmem:[#allocation7 + $0x20] ss:$8 sps:$4 sm:$0xff]   ;;  %v2975_v56 = vsub.s32 0, %v502_v53 }
  0xa4   : > { %s2962_s22 = scalar_lea.vmem %s3109_s1, %s1951_s23  ;;  %890 = vmatprep.subr.bf16.mxu1 %v2252_v7  ;;  %v2258_v12 = vld [vmem:[#allocation7 + $0x34] ss:$8 sps:$4 sm:$0xff]   ;;  %v2260_v13 = vld [vmem:[#allocation7 + $0x30] ss:$8 sps:$4 sm:$0xff]   ;;  %v2261_v14 = vld [vmem:[#allocation7 + $0x44] ss:$8 sps:$4 sm:$0xff]  }
  0xa5   : > { %v2245_v4 = vld [vmem:[%s2962_s22] sm:$0xff]   ;;  %v2246_v10 = vld [vmem:[%s2962_s22 + $0x8] sm:$0xff]   ;;  %v2247_v15 = vld [vmem:[%s2962_s22 + $0x10] sm:$0xff]   ;;  %v2980_v58 = vsub.s32 1, %v502_v53  ;;  %s3145_s15 = sld [smem:[#allocation18_spill]]  ;;  %s3146_s8 = sld [smem:[#allocation19_spill]] }
  0xa6   : > { %1959 = vmatmul.mubr.msk.bf16.vlgmr.msra.gmra.mrb[0].mxu0 %vm539_vm1, %v2245_v4  ;;  %v2263_v16 = vld [vmem:[#allocation7 + $0x40] ss:$8 sps:$4 sm:$0xff]   ;;  %v2264_v17 = vld [vmem:[#allocation7 + $0x54] ss:$8 sps:$4 sm:$0xff]   ;;  %v2266_v18 = vld [vmem:[#allocation7 + $0x50] ss:$8 sps:$4 sm:$0xff]  }
  0xa7   : > { %601 = vmatprep.mubr.bf16.mxu0 %v2648_v0  ;;  %891 = vmatpush1.bf16.msra.mxu1 %v2254_v8  ;;  %v2267_v19 = vld [vmem:[#allocation7 + $0x64] ss:$8 sps:$4 sm:$0xff]   ;;  %v2248_v20 = vld [vmem:[%s2962_s22 + $0x18] sm:$0xff]   ;;  %v2269_v21 = vld [vmem:[#allocation7 + $0x60] ss:$8 sps:$4 sm:$0xff]   ;;  %s3047_s22 = scalar_lea.vmem [#allocation11], %s1944_s27 }
  0xa8   : > { %892 = vmatprep.subr.bf16.mxu1 %v2255_v9  ;;  %v2270_v22 = vld [vmem:[#allocation7 + $0x74] ss:$8 sps:$4 sm:$0xff]   ;;  %v2272_v23 = vld [vmem:[#allocation7 + $0x70] ss:$8 sps:$4 sm:$0xff]   ;;  %v2273_v24 = vld [vmem:[#allocation7 + $0x84] ss:$8 sps:$4 sm:$0xff]  }
  0xa9   : > { %v2275_v25 = vld [vmem:[#allocation7 + $0x80] ss:$8 sps:$4 sm:$0xff]   ;;  %v2276_v26 = vld [vmem:[#allocation7 + $0x94] ss:$8 sps:$4 sm:$0xff]   ;;  %v2278_v27 = vld [vmem:[#allocation7 + $0x90] ss:$8 sps:$4 sm:$0xff]  }
  0xaa   : > { %v2279_v28 = vld [vmem:[#allocation7 + $0xa4] ss:$8 sps:$4 sm:$0xff]   ;;  %v2281_v29 = vld [vmem:[#allocation7 + $0xa0] ss:$8 sps:$4 sm:$0xff]   ;;  %v2282_v30 = vld [vmem:[#allocation7 + $0xb4] ss:$8 sps:$4 sm:$0xff]  }
  0xab   : > { %893 = vmatpush1.bf16.msra.mxu1 %v2257_v11  ;;  %v2284_v31 = vld [vmem:[#allocation7 + $0xb0] ss:$8 sps:$4 sm:$0xff]   ;;  %v2285_v32 = vld [vmem:[#allocation7 + $0xc4] ss:$8 sps:$4 sm:$0xff]   ;;  %v2287_v33 = vld [vmem:[#allocation7 + $0xc0] ss:$8 sps:$4 sm:$0xff]  }
  0xac   : > { %894 = vmatprep.subr.bf16.mxu1 %v2258_v12  ;;  %v2288_v34 = vld [vmem:[#allocation7 + $0xd4] ss:$8 sps:$4 sm:$0xff]   ;;  %v2290_v35 = vld [vmem:[#allocation7 + $0xd0] ss:$8 sps:$4 sm:$0xff]   ;;  %v2291_v36 = vld [vmem:[#allocation7 + $0xe4] ss:$8 sps:$4 sm:$0xff]  }
  0xad   : > { %v2293_v37 = vld [vmem:[#allocation7 + $0xe0] ss:$8 sps:$4 sm:$0xff]   ;;  %v2294_v38 = vld [vmem:[#allocation7 + $0xf4] ss:$8 sps:$4 sm:$0xff]   ;;  %v2296_v39 = vld [vmem:[#allocation7 + $0xf0] ss:$8 sps:$4 sm:$0xff]  }
  0xae   : > { %1960 = vmatmul.mubr.msk.bf16.gmra.mrb[4].mxu0 %vm539_vm1, %v2246_v10  ;;  %v2299_v40 = vld [vmem:[#allocation5 + $0x4] ss:$8 sps:$4 sm:$0xff]   ;;  %v2357_v41 = vld [vmem:[#allocation8] ss:$8 sps:$4 sm:$0xff]   ;;  %v2362_v43 = vld [vmem:[#allocation8 + $0x14] ss:$8 sps:$4 sm:$0xff]  }
  0xaf   : > { %611 = vmatprep.mubr.bf16.mxu0 %v2648_v0  ;;  %895 = vmatpush1.bf16.msra.mxu1 %v2260_v13  ;;  %v2359_v42 = vld [vmem:[#allocation8 + $0x4] ss:$8 sps:$4 sm:$0xff]   ;;  %v2360_v44 = vld [vmem:[#allocation8 + $0x10] ss:$8 sps:$4 sm:$0xff]   ;;  %v2363_v46 = vld [vmem:[#allocation8 + $0x20] ss:$8 sps:$4 sm:$0xff]  }
  0xb0   : > { %896 = vmatprep.subr.bf16.mxu1 %v2261_v14  ;;  %1490 = vmatprep.subr.bf16.mxu0 %v2359_v42  ;;  %v2365_v45 = vld [vmem:[#allocation8 + $0x24] ss:$8 sps:$4 sm:$0xff]   ;;  %v2368_v47 = vld [vmem:[#allocation8 + $0x34] ss:$8 sps:$4 sm:$0xff]   ;;  %v2366_v48 = vld [vmem:[#allocation8 + $0x30] ss:$8 sps:$4 sm:$0xff]  }
  0xb1   : > { %1491 = vmatpush1.bf16.msra.mxu0 %v2357_v41  ;;  %v2371_v49 = vld [vmem:[#allocation8 + $0x44] ss:$8 sps:$4 sm:$0xff]   ;;  %v2369_v51 = vld [vmem:[#allocation8 + $0x40] ss:$8 sps:$4 sm:$0xff]   ;;  %v2374_v52 = vld [vmem:[#allocation8 + $0x54] ss:$8 sps:$4 sm:$0xff]  }
  0xb2   : > { %1492 = vmatprep.subr.bf16.mxu0 %v2362_v43  ;;  %v2372_v54 = vld [vmem:[#allocation8 + $0x50] ss:$8 sps:$4 sm:$0xff]   ;;  %v2377_v55 = vld [vmem:[#allocation8 + $0x64] ss:$8 sps:$4 sm:$0xff]   ;;  %v499_v57 = vld [vmem:[%s3111_s3] sm:$0x3] }
  0xb3   : > { %897 = vmatpush1.bf16.msra.mxu1 %v2263_v16  ;;  %v2375_v59 = vld [vmem:[#allocation8 + $0x60] ss:$8 sps:$4 sm:$0xff]   ;;  %v2380_v60 = vld [vmem:[#allocation8 + $0x74] ss:$8 sps:$4 sm:$0xff]   ;;  %v2983_v61 = vrot.slane %v499_v57, %v2975_v56  ;;  %v2986_v62 = vrot.slane %v499_v57, %v2980_v58  ;;  %v2378_v63 = vld [vmem:[#allocation8 + $0x70] ss:$8 sps:$4 sm:$0xff]  }
  0xb4   : > { %898 = vmatprep.subr.bf16.mxu1 %v2264_v17  ;;  %v2381_v6 = vld [vmem:[#allocation8 + $0x80] ss:$8 sps:$4 sm:$0xff]   ;;  %v2386_v9 = vld [vmem:[#allocation8 + $0x94] ss:$8 sps:$4 sm:$0xff]   ;;  %v2389_v17 = vld [vmem:[#allocation8 + $0xa4] ss:$8 sps:$4 sm:$0xff]  }
  0xb5   : > { %1493 = vmatpush1.bf16.msra.mxu0 %v2360_v44  ;;  %v2308_v43 = vld [vmem:[#allocation5 + $0x34] ss:$8 sps:$4 sm:$0xff]   ;;  %v2306_v53 = vld [vmem:[#allocation5 + $0x30] ss:$8 sps:$4 sm:$0xff]   ;;  %v2311_v57 = vld [vmem:[#allocation5 + $0x44] ss:$8 sps:$4 sm:$0xff]  }
  0xb6   : > { %1961 = vmatmul.mubr.msk.bf16.gmra.mrb[8].mxu0 %vm539_vm1, %v2247_v15  ;;  %1494 = vmatprep.subr.bf16.mxu0 %v2365_v45  ;;  %v2384_v15 = vld [vmem:[#allocation8 + $0x90] ss:$8 sps:$4 sm:$0xff]   ;;  %s1809_s27 = sshll.u32 %s3047_s22, 4  ;;  %s2091_s28 = sshll.u32 %s2733_s21, 10  ;;  %s3057_s27 = int_to_ptr.vmem [resolvable:$true] %s1809_s27 }
  0xb7   : > { %621 = vmatprep.mubr.bf16.mxu0 %v2648_v0  ;;  %899 = vmatpush1.bf16.msra.mxu1 %v2266_v18  ;;  %v2383_v0 = vld [vmem:[#allocation8 + $0x84] ss:$8 sps:$4 sm:$0xff]   ;;  %s3147_s13 = sld [smem:[#allocation20_spill]]  ;;  %s1796_s25 = scalar_lea.sflag [#allocation4], %s2935_s26 }
  0xb8   : > { %900 = vmatprep.subr.bf16.mxu1 %v2267_v19  ;;  %v2297_v19 = vld [vmem:[#allocation5] ss:$8 sps:$4 sm:$0xff]   ;;  %s2649_s21 = smov [#allocation11]  }
  0xb9   : > { %1495 = vmatpush1.bf16.msra.mxu0 %v2363_v46  ;;  %s2567_s23 = sshll.u32 %s2649_s21, 4  ;;  %s2568_s23 = int_to_ptr.vmem [resolvable:$false] %s2567_s23 }
  0xba   : > { %1496 = vmatprep.subr.bf16.mxu0 %v2368_v47  ;;  %p2570_p1 = scmp.lt.s32.totalorder %s3057_s27, %s2568_s23 }
  0xbb   : > { %901 = vmatpush1.bf16.msra.mxu1 %v2269_v21  ;;  %v2302_v21 = vld [vmem:[#allocation5 + $0x14] ss:$8 sps:$4 sm:$0xff]  }
  0xbc   : > { %902 = vmatprep.subr.bf16.mxu1 %v2270_v22 }
  0xbd   : > { %1497 = vmatpush1.bf16.msra.mxu0 %v2366_v48  ;;  %v2393_v48 = vld [vmem:[#allocation8 + $0xc0] ss:$8 sps:$4 sm:$0xff]   ;;  %s3062_s24 = scalar_lea.hbm %s3147_s13, %s2091_s28 }
  0xbe   : > { %1962 = vmatmul.mubr.msk.bf16.gmra.mrb[12].mxu0 %vm539_vm1, %v2248_v20  ;;  %1498 = vmatprep.subr.bf16.mxu0 %v2371_v49 }
  0xbf   : > { %903 = vmatpush1.bf16.msra.mxu1 %v2272_v23 }
  0xc0   : > { %904 = vmatprep.subr.bf16.mxu1 %v2273_v24 }
  0xc1   : > { %1499 = vmatpush1.bf16.msra.mxu0 %v2369_v51 }
  0xc2   : > { %1500 = vmatprep.subr.bf16.mxu0 %v2374_v52  ;;  %v2398_v52 = vld [vmem:[#allocation8 + $0xd4] ss:$8 sps:$4 sm:$0xff]  }
  0xc3   : > { %905 = vmatpush1.bf16.msra.mxu1 %v2275_v25 }
  0xc4   : > { %906 = vmatprep.subr.bf16.mxu1 %v2276_v26  ;;  %v2387_v26 = vld [vmem:[#allocation8 + $0xa0] ss:$8 sps:$4 sm:$0xff]  }
  0xc5   : > { %1501 = vmatpush1.bf16.msra.mxu0 %v2372_v54 }
  0xc6   : > { %1502 = vmatprep.subr.bf16.mxu0 %v2377_v55 }
  0xc7   : > { %907 = vmatpush1.bf16.msra.mxu1 %v2278_v27 }
  0xc8   : > { %908 = vmatprep.subr.bf16.mxu1 %v2279_v28 }
  0xc9   : > { %1503 = vmatpush1.bf16.msra.mxu0 %v2375_v59 }
  0xca   : > { %1504 = vmatprep.subr.bf16.mxu0 %v2380_v60 }
  0xcb   : > { %909 = vmatpush1.bf16.msra.mxu1 %v2281_v29 }
  0xcc   : > { %910 = vmatprep.subr.bf16.mxu1 %v2282_v30  ;;  %v2392_v30 = vld [vmem:[#allocation8 + $0xb4] ss:$8 sps:$4 sm:$0xff]  }
  0xcd   : > { %1505 = vmatpush1.bf16.msra.mxu0 %v2378_v63  ;;  %v2396_v63 = vld [vmem:[#allocation8 + $0xd0] ss:$8 sps:$4 sm:$0xff]  }
  0xce   : > { %1506 = vmatprep.subr.bf16.mxu0 %v2383_v0 }
  0xcf   : > { %911 = vmatpush1.bf16.msra.mxu1 %v2284_v31  ;;  %v2300_v31 = vld [vmem:[#allocation5 + $0x10] ss:$8 sps:$4 sm:$0xff]  }
  0xd0   : > { %912 = vmatprep.subr.bf16.mxu1 %v2285_v32 }
  0xd1   : > { %1507 = vmatpush1.bf16.msra.mxu0 %v2381_v6 }
  0xd2   : > { %1508 = vmatprep.subr.bf16.mxu0 %v2386_v9 }
  0xd3   : > { %913 = vmatpush1.bf16.msra.mxu1 %v2287_v33 }
  0xd4   : > { %914 = vmatprep.subr.bf16.mxu1 %v2288_v34  ;;  %v2305_v34 = vld [vmem:[#allocation5 + $0x24] ss:$8 sps:$4 sm:$0xff]  }
  0xd5   : > { %1509 = vmatpush1.bf16.msra.mxu0 %v2384_v15  ;;  %v2317_v15 = vld [vmem:[#allocation5 + $0x64] ss:$8 sps:$4 sm:$0xff]  }
  0xd6   : > { %1510 = vmatprep.subr.bf16.mxu0 %v2389_v17 }
  0xd7   : > { %915 = vmatpush1.bf16.msra.mxu1 %v2290_v35 }
  0xd8   : > { %916 = vmatprep.subr.bf16.mxu1 %v2291_v36 }
  0xd9   : > { %1511 = vmatpush1.bf16.msra.mxu0 %v2387_v26  ;;  %v2329_v26 = vld [vmem:[#allocation5 + $0xa4] ss:$8 sps:$4 sm:$0xff]  }
  0xda   : > { %1512 = vmatprep.subr.bf16.mxu0 %v2392_v30  ;;  %v2335_v30 = vld [vmem:[#allocation5 + $0xc4] ss:$8 sps:$4 sm:$0xff]  }
  0xdb   : > { %917 = vmatpush1.bf16.msra.mxu1 %v2293_v37  ;;  %v2390_v37 = vld [vmem:[#allocation8 + $0xb0] ss:$8 sps:$4 sm:$0xff]  }
  0xdc   : > { %918 = vmatprep.subr.bf16.mxu1 %v2294_v38 }
  0xdd   : > { %1513 = vmatpush1.bf16.msra.mxu0 %v2390_v37  ;;  %v2342_v37 = vld [vmem:[#allocation5 + $0xf0] ss:$8 sps:$4 sm:$0xff]  }
  0xdf   : > { %919 = vmatpush1.bf16.msra.mxu1 %v2296_v39  ;;  %v2395_v39 = vld [vmem:[#allocation8 + $0xc4] ss:$8 sps:$4 sm:$0xff]  }
  0xe0   : > { %1161 = vmatprep.subr.bf16.mxu1 %v2299_v40  ;;  %v2303_v40 = vld [vmem:[#allocation5 + $0x20] ss:$8 sps:$4 sm:$0xff]   ;;  %1514 = vmatprep.subr.bf16.mxu0 %v2395_v39  ;;  %v2348_v39 = vld [vmem:[%s2941_s10 + $0x14] ss:$8 sps:$4 sm:$0xff]  }
  0xe1   : > { %1515 = vmatpush1.bf16.msra.mxu0 %v2393_v48  ;;  %v2402_v48 = vld [vmem:[#allocation8 + $0xf0] ss:$8 sps:$4 sm:$0xff]  }
  0xe2   : > { %1516 = vmatprep.subr.bf16.mxu0 %v2398_v52 }
  0xe5   : > { %1517 = vmatpush1.bf16.msra.mxu0 %v2396_v63 }
 0x179   : > { %v593_v1 = vpop.f32.mrb[0].mxu0 }
 0x17a   : > { %v594_v2 = vadd.f32 %v593_v1, %v2983_v61  ;;  %v595_v3 = vpop.f32.mrb[1].mxu0  ;;  %v2309_v1 = vld [vmem:[#allocation5 + $0x40] ss:$8 sps:$4 sm:$0xff]  }
 0x17b   : > { %v596_v4 = vadd.f32 %v595_v3, %v2986_v62  ;;  %v597_v5 = vpop.f32.mrb[2].mxu0 }
 0x17c   : > { %v598_v7 = vadd.f32 %v597_v5, %v2983_v61  ;;  %v599_v8 = vpop.f32.mrb[3].mxu0  ;;  %v632_v11 = vmax.f32 %v594_v2, 0.0 }
 0x17d   : > { %v600_v10 = vadd.f32 %v599_v8, %v2986_v62  ;;  %v633_v13 = vmax.f32 %v596_v4, 0.0  ;;  %v2314_v4 = vld [vmem:[#allocation5 + $0x54] ss:$8 sps:$4 sm:$0xff]  }
 0x17e   : > { %v634_v12 = vmax.f32 %v598_v7, 0.0 }
 0x17f   : > { %v635_v14 = vmax.f32 %v600_v10, 0.0 }
 0x180   : > { %v688_v16 = vpack.c.bf16 %v634_v12, %v632_v11  ;;  %v2312_v12 = vld [vmem:[#allocation5 + $0x50] ss:$8 sps:$4 sm:$0xff]  }
 0x181   : > { %v689_v18 = vpack.c.bf16 %v635_v14, %v633_v13  ;;  %v603_v20 = vpop.f32.mrb[4].mxu0 }
 0x182   : > { %v604_v22 = vadd.f32 %v603_v20, %v2983_v61  ;;  %v605_v23 = vpop.f32.mrb[5].mxu0 }
 0x183   : > { %920 = vmatprep.mubr.bf16.mxu1 %v689_v18  ;;  %v606_v24 = vadd.f32 %v605_v23, %v2986_v62  ;;  %v607_v25 = vpop.f32.mrb[6].mxu0  ;;  %v2323_v23 = vld [vmem:[#allocation5 + $0x84] ss:$8 sps:$4 sm:$0xff]  }
 0x184   : > { %921 = vmatmul.mubr.bf16.vlgmr.msra.gmra.mrb[0].mxu1 %v688_v16  ;;  %v636_v27 = vmax.f32 %v604_v22, 0.0  ;;  %v608_v28 = vadd.f32 %v607_v25, %v2983_v61  ;;  %v609_v29 = vpop.f32.mrb[7].mxu0  ;;  %v2320_v22 = vld [vmem:[#allocation5 + $0x74] ss:$8 sps:$4 sm:$0xff]   ;;  %v2324_v25 = vld [vmem:[#allocation5 + $0x90] ss:$8 sps:$4 sm:$0xff]  }
 0x185   : > { %1162 = vmatpush1.bf16.msra.mxu1 %v2297_v19  ;;  %v637_v32 = vmax.f32 %v606_v24, 0.0  ;;  %v610_v33 = vadd.f32 %v609_v29, %v2986_v62  ;;  %v2315_v19 = vld [vmem:[#allocation5 + $0x60] ss:$8 sps:$4 sm:$0xff]   ;;  %v2326_v24 = vld [vmem:[#allocation5 + $0x94] ss:$8 sps:$4 sm:$0xff]  }
 0x186   : > { %1163 = vmatprep.subr.bf16.mxu1 %v2302_v21  ;;  %v638_v35 = vmax.f32 %v608_v28, 0.0  ;;  %v2347_v21 = vld [vmem:[%s2941_s10 + $0x4] ss:$8 sps:$4 sm:$0xff]   ;;  %v2332_v28 = vld [vmem:[#allocation5 + $0xb4] ss:$8 sps:$4 sm:$0xff]  }
 0x187   : > { %v639_v36 = vmax.f32 %v610_v33, 0.0  ;;  %v2330_v29 = vld [vmem:[#allocation5 + $0xb0] ss:$8 sps:$4 sm:$0xff]  }
 0x188   : > { %v690_v38 = vpack.c.bf16 %v638_v35, %v636_v27  ;;  %v2327_v27 = vld [vmem:[#allocation5 + $0xa0] ss:$8 sps:$4 sm:$0xff]   ;;  %v2336_v33 = vld [vmem:[#allocation5 + $0xd0] ss:$8 sps:$4 sm:$0xff]  }
 0x189   : > { %1164 = vmatpush1.bf16.msra.mxu1 %v2300_v31  ;;  %v691_v41 = vpack.c.bf16 %v639_v36, %v637_v32  ;;  %v613_v42 = vpop.f32.mrb[8].mxu0  ;;  %v2333_v31 = vld [vmem:[#allocation5 + $0xc0] ss:$8 sps:$4 sm:$0xff]   ;;  %v2338_v32 = vld [vmem:[#allocation5 + $0xd4] ss:$8 sps:$4 sm:$0xff]  }
 0x18a   : > { %1165 = vmatprep.subr.bf16.mxu1 %v2305_v34  ;;  %v614_v44 = vadd.f32 %v613_v42, %v2983_v61  ;;  %v615_v45 = vpop.f32.mrb[9].mxu0  ;;  %v2341_v34 = vld [vmem:[#allocation5 + $0xe4] ss:$8 sps:$4 sm:$0xff]   ;;  %v2339_v35 = vld [vmem:[#allocation5 + $0xe0] ss:$8 sps:$4 sm:$0xff]  }
 0x18b   : > { %v616_v46 = vadd.f32 %v615_v45, %v2986_v62  ;;  %v617_v47 = vpop.f32.mrb[10].mxu0  ;;  %930 = vmatprep.mubr.bf16.mxu1 %v691_v41  ;;  %v2344_v36 = vld [vmem:[#allocation5 + $0xf4] ss:$8 sps:$4 sm:$0xff]   ;;  %v2351_v41 = vld [vmem:[%s2941_s10 + $0x24] ss:$8 sps:$4 sm:$0xff]  }
 0x18c   : > { %v640_v49 = vmax.f32 %v614_v44, 0.0  ;;  %v618_v50 = vadd.f32 %v617_v47, %v2983_v61  ;;  %v619_v51 = vpop.f32.mrb[11].mxu0  ;;  %931 = vmatmul.mubr.bf16.gmra.mrb[4].mxu1 %v690_v38  ;;  %v2345_v38 = vld [vmem:[%s2941_s10] ss:$8 sps:$4 sm:$0xff]   ;;  %v2356_v44 = vld [vmem:[%s2941_s10 + $0x30] ss:$8 sps:$4 sm:$0xff]  }
 0x18d   : > { %1166 = vmatpush1.bf16.msra.mxu1 %v2303_v40  ;;  %v641_v54 = vmax.f32 %v616_v46, 0.0  ;;  %v620_v55 = vadd.f32 %v619_v51, %v2986_v62  ;;  %v2350_v40 = vld [vmem:[%s2941_s10 + $0x10] ss:$8 sps:$4 sm:$0xff]   ;;  %v2353_v42 = vld [vmem:[%s2941_s10 + $0x20] ss:$8 sps:$4 sm:$0xff]  }
 0x18e   : > { %1167 = vmatprep.subr.bf16.mxu1 %v2308_v43  ;;  %v642_v59 = vmax.f32 %v618_v50, 0.0  ;;  %v2354_v43 = vld [vmem:[%s2941_s10 + $0x34] ss:$8 sps:$4 sm:$0xff]   ;;  %v2401_v45 = vld [vmem:[#allocation8 + $0xe4] ss:$8 sps:$4 sm:$0xff]   ;;  %s2563_s10 = scalar_lea.vmem %s3057_s27, 1024 }
 0x18f   : > { %v643_v60 = vmax.f32 %v620_v55, 0.0  ;;  %v2399_v46 = vld [vmem:[#allocation8 + $0xe0] ss:$8 sps:$4 sm:$0xff]   ;;  %1518 = vmatprep.subr.bf16.mxu0 %v2401_v45  ;;  %v2404_v47 = vld [vmem:[#allocation8 + $0xf4] ss:$8 sps:$4 sm:$0xff]   ;;  %p2564_p5 = scmp.ne.s32.totalorder %s3057_s27, %s2563_s10 }
 0x190   : > { %v692_v0 = vpack.c.bf16 %v642_v59, %v640_v49  ;;  %1519 = vmatpush1.bf16.msra.mxu0 %v2399_v46  ;;  %v2405_v49 = vld [vmem:[#allocation10 + $0x40] sm:$0xff]   ;;  %v2415_v45 = vld [vmem:[#allocation10 + $0x68] sm:$0xff]  }
 0x191   : > { %1168 = vmatpush1.bf16.msra.mxu1 %v2306_v53  ;;  %v693_v2 = vpack.c.bf16 %v643_v60, %v641_v54  ;;  %v623_v3 = vpop.f32.mrb[12].mxu0  ;;  %1520 = vmatprep.subr.bf16.mxu0 %v2404_v47  ;;  %v1234_v50 = vld [vmem:[%s3114_s6] sm:$0x3]  ;;  %p2565_p7 = pnand %p2564_p5, %p2883_p3 }
 0x192   : > { %1169 = vmatprep.subr.bf16.mxu1 %v2311_v57  ;;  %v624_v5 = vadd.f32 %v623_v3, %v2983_v61  ;;  %v625_v6 = vpop.f32.mrb[13].mxu0  ;;  %v3016_v51 = vrot.slane %v1234_v50, %v2975_v56  ;;  %v3019_v52 = vrot.slane %v1234_v50, %v2980_v58 }
 0x193   : > { %v626_v7 = vadd.f32 %v625_v6, %v2986_v62  ;;  %v627_v8 = vpop.f32.mrb[14].mxu0  ;;  %940 = vmatprep.mubr.bf16.mxu1 %v693_v2  ;;  %p2566_p12 = pneg %p2565_p7 }
 0x194   : > { %v644_v9 = vmax.f32 %v624_v5, 0.0  ;;  %v628_v10 = vadd.f32 %v627_v8, %v2983_v61  ;;  %v629_v11 = vpop.f32.mrb[15].mxu0  ;;  %941 = vmatmul.mubr.bf16.gmra.mrb[8].mxu1 %v692_v0  ;;  %v2318_v61 = vld [vmem:[#allocation5 + $0x70] ss:$8 sps:$4 sm:$0xff]   ;;  %1521 = vmatpush1.bf16.msra.mxu0 %v2402_v48  ;;  %v2406_v8 = vld [vmem:[#allocation10] sm:$0xff]  }
 0x195   : > { %1170 = vmatpush1.bf16.msra.mxu1 %v2309_v1  ;;  %v645_v13 = vmax.f32 %v626_v7, 0.0  ;;  %v630_v14 = vadd.f32 %v629_v11, %v2986_v62  ;;  %v2321_v62 = vld [vmem:[#allocation5 + $0x80] ss:$8 sps:$4 sm:$0xff]   ;;  %2092 = vmatprep.subr.bf16.mxu0 %v2405_v49 }
 0x196   : > { %1171 = vmatprep.subr.bf16.mxu1 %v2314_v4  ;;  %v646_v16 = vmax.f32 %v628_v10, 0.0  ;;  %v2407_v11 = vld [vmem:[#allocation10 + $0x48] sm:$0xff]  }
 0x197   : > { %v647_v17 = vmax.f32 %v630_v14, 0.0 }
 0x198   : > { %v694_v18 = vpack.c.bf16 %v646_v16, %v644_v9 }
 0x199   : > { %1172 = vmatpush1.bf16.msra.mxu1 %v2312_v12  ;;  %v695_v20 = vpack.c.bf16 %v647_v17, %v645_v13  ;;  %v2408_v17 = vld [vmem:[#allocation10 + $0x8] sm:$0xff]  }
 0x19a   : > { %1173 = vmatprep.subr.bf16.mxu1 %v2317_v15 }
 0x19b   : > { %950 = vmatprep.mubr.bf16.mxu1 %v695_v20  ;;  %v2409_v20 = vld [vmem:[#allocation10 + $0x50] sm:$0xff]  }
 0x19c   : > { %951 = vmatmul.mubr.bf16.gmra.mrb[12].mxu1 %v694_v18 }
 0x19d   : > { %1174 = vmatpush1.bf16.msra.mxu1 %v2315_v19  ;;  %1193 = vmatprep.mubr.bf16.mxu1 %v2347_v21 }
 0x19e   : > { %1175 = vmatprep.subr.bf16.mxu1 %v2320_v22 }
 0x1a1   : > { %1176 = vmatpush1.bf16.msra.mxu1 %v2318_v61 }
 0x1a2   : > { %1177 = vmatprep.subr.bf16.mxu1 %v2323_v23 }
 0x1a5   : > { %1178 = vmatpush1.bf16.msra.mxu1 %v2321_v62 }
 0x1a6   : > { %1179 = vmatprep.subr.bf16.mxu1 %v2326_v24  ;;  %v2410_v24 = vld [vmem:[#allocation10 + $0x10] sm:$0xff]  }
 0x1a9   : > { %1180 = vmatpush1.bf16.msra.mxu1 %v2324_v25 }
 0x1aa   : > { %1181 = vmatprep.subr.bf16.mxu1 %v2329_v26 }
 0x1ad   : > { %1182 = vmatpush1.bf16.msra.mxu1 %v2327_v27  ;;  %v2411_v27 = vld [vmem:[#allocation10 + $0x58] sm:$0xff]  }
 0x1ae   : > { %1183 = vmatprep.subr.bf16.mxu1 %v2332_v28 }
 0x1b1   : > { %1184 = vmatpush1.bf16.msra.mxu1 %v2330_v29 }
 0x1b2   : > { %1185 = vmatprep.subr.bf16.mxu1 %v2335_v30 }
 0x1b5   : > { %1186 = vmatpush1.bf16.msra.mxu1 %v2333_v31 }
 0x1b6   : > { %1187 = vmatprep.subr.bf16.mxu1 %v2338_v32 }
 0x1b9   : > { %1188 = vmatpush1.bf16.msra.mxu1 %v2336_v33  ;;  %v2412_v33 = vld [vmem:[#allocation10 + $0x18] sm:$0xff]  }
 0x1ba   : > { %1189 = vmatprep.subr.bf16.mxu1 %v2341_v34 }
 0x1bd   : > { %1190 = vmatpush1.bf16.msra.mxu1 %v2339_v35 }
 0x1be   : > { %1191 = vmatprep.subr.bf16.mxu1 %v2344_v36  ;;  %v2413_v36 = vld [vmem:[#allocation10 + $0x60] sm:$0xff]  }
 0x1c1   : > { %1192 = vmatpush1.bf16.msra.mxu1 %v2342_v37 }
 0x1c4   : > { %1194 = vmatmul.mubr.bf16.vlgmr.msra.gmra.mrb[0].mxu1 %v2345_v38 }
 0x1c5   : > { %1203 = vmatprep.mubr.bf16.mxu1 %v2348_v39 }
 0x1cc   : > { %1204 = vmatmul.mubr.bf16.gmra.mrb[4].mxu1 %v2350_v40 }
 0x1cd   : > { %1213 = vmatprep.mubr.bf16.mxu1 %v2351_v41 }
 0x1d4   : > { %1214 = vmatmul.mubr.bf16.gmra.mrb[8].mxu1 %v2353_v42  ;;  %v2414_v42 = vld [vmem:[#allocation10 + $0x20] sm:$0xff]  }
 0x1d5   : > { %1223 = vmatprep.mubr.bf16.mxu1 %v2354_v43 }
 0x1dc   : > { %1224 = vmatmul.mubr.bf16.gmra.mrb[12].mxu1 %v2356_v44 }
 0x297   : > { %v1195_v53 = vpop.f32.mrb[0].mxu1 }
 0x298   : > { %v1246_v54 = vadd.f32 %v3016_v51, %v1195_v53  ;;  %v1197_v55 = vpop.f32.mrb[1].mxu1  ;;  %v2416_v53 = vld [vmem:[#allocation10 + $0x28] sm:$0xff]  }
 0x299   : > { %v1247_v57 = vadd.f32 %v3019_v52, %v1197_v55  ;;  %v1199_v59 = vpop.f32.mrb[2].mxu1 }
 0x29a   : > { %v1248_v60 = vadd.f32 %v3016_v51, %v1199_v59  ;;  %v1201_v63 = vpop.f32.mrb[3].mxu1  ;;  %v1262_v1 = vmax.f32 %v1246_v54, 0.0 }
 0x29b   : > { %v1249_v0 = vadd.f32 %v3019_v52, %v1201_v63  ;;  %v1263_v3 = vmax.f32 %v1247_v57, 0.0 }
 0x29c   : > { %v1264_v2 = vmax.f32 %v1248_v60, 0.0 }
 0x29d   : > { %v1265_v4 = vmax.f32 %v1249_v0, 0.0  ;;  %v2417_v0 = vld [vmem:[#allocation10 + $0x70] sm:$0xff]  }
 0x29e   : > { %v1278_v5 = vpack.c.bf16 %v1264_v2, %v1262_v1  ;;  %v2418_v1 = vld [vmem:[#allocation10 + $0x30] sm:$0xff]   ;;  %v2420_v2 = vld [vmem:[#allocation10 + $0x38] sm:$0xff]  }
 0x29f   : > { %v1279_v6 = vpack.c.bf16 %v1265_v4, %v1263_v3  ;;  %v1205_v7 = vpop.f32.mrb[4].mxu1 }
 0x2a0   : > { %v1250_v9 = vadd.f32 %v3016_v51, %v1205_v7  ;;  %v1207_v10 = vpop.f32.mrb[5].mxu1 }
 0x2a1   : > { %v1251_v12 = vadd.f32 %v3019_v52, %v1207_v10  ;;  %v1209_v13 = vpop.f32.mrb[6].mxu1  ;;  %1522 = vmatprep.mubr.bf16.mxu0 %v1279_v6 }
 0x2a2   : > { %v1252_v14 = vadd.f32 %v3016_v51, %v1209_v13  ;;  %v1211_v15 = vpop.f32.mrb[7].mxu1  ;;  %1523 = vmatmul.mubr.bf16.vlgmr.msra.gmra.mrb[16].mxu0 %v1278_v5  ;;  %v1266_v18 = vmax.f32 %v1250_v9, 0.0 }
 0x2a3   : > { %v1253_v16 = vadd.f32 %v3019_v52, %v1211_v15  ;;  %2093 = vmatpush3.bf16.msra.mxu0 %v2406_v8  ;;  %v1267_v21 = vmax.f32 %v1251_v12, 0.0 }
 0x2a4   : > { %v1268_v19 = vmax.f32 %v1252_v14, 0.0  ;;  %2094 = vmatprep.subr.bf16.mxu0 %v2407_v11 }
 0x2a5   : > { %v1269_v22 = vmax.f32 %v1253_v16, 0.0 }
 0x2a6   : > { %v1280_v61 = vpack.c.bf16 %v1268_v19, %v1266_v18 }
 0x2a7   : > { %v1281_v23 = vpack.c.bf16 %v1269_v22, %v1267_v21  ;;  %v1215_v62 = vpop.f32.mrb[8].mxu1  ;;  %2095 = vmatpush3.bf16.msra.mxu0 %v2408_v17 }
 0x2a8   : > { %v1254_v25 = vadd.f32 %v3016_v51, %v1215_v62  ;;  %v1217_v26 = vpop.f32.mrb[9].mxu1  ;;  %2096 = vmatprep.subr.bf16.mxu0 %v2409_v20 }
 0x2a9   : > { %v1255_v28 = vadd.f32 %v3019_v52, %v1217_v26  ;;  %v1219_v29 = vpop.f32.mrb[10].mxu1  ;;  %1532 = vmatprep.mubr.bf16.mxu0 %v1281_v23 }
 0x2aa   : > { %v1256_v30 = vadd.f32 %v3016_v51, %v1219_v29  ;;  %v1221_v31 = vpop.f32.mrb[11].mxu1  ;;  %1533 = vmatmul.mubr.bf16.gmra.mrb[20].mxu0 %v1280_v61  ;;  %v1270_v34 = vmax.f32 %v1254_v25, 0.0 }
 0x2ab   : > { %v1257_v32 = vadd.f32 %v3019_v52, %v1221_v31  ;;  %2097 = vmatpush3.bf16.msra.mxu0 %v2410_v24  ;;  %v1271_v37 = vmax.f32 %v1255_v28, 0.0 }
 0x2ac   : > { %v1272_v35 = vmax.f32 %v1256_v30, 0.0  ;;  %2098 = vmatprep.subr.bf16.mxu0 %v2411_v27 }
 0x2ad   : > { %v1273_v38 = vmax.f32 %v1257_v32, 0.0 }
 0x2ae   : > { %v1282_v39 = vpack.c.bf16 %v1272_v35, %v1270_v34 }
 0x2af   : > { %v1283_v40 = vpack.c.bf16 %v1273_v38, %v1271_v37  ;;  %v1225_v41 = vpop.f32.mrb[12].mxu1  ;;  %2099 = vmatpush3.bf16.msra.mxu0 %v2412_v33 }
 0x2b0   : > { %v1258_v43 = vadd.f32 %v3016_v51, %v1225_v41  ;;  %v1227_v44 = vpop.f32.mrb[13].mxu1  ;;  %2100 = vmatprep.subr.bf16.mxu0 %v2413_v36 }
 0x2b1   : > { %v1259_v46 = vadd.f32 %v3019_v52, %v1227_v44  ;;  %v1229_v47 = vpop.f32.mrb[14].mxu1  ;;  %1542 = vmatprep.mubr.bf16.mxu0 %v1283_v40 }
 0x2b2   : > { %v1260_v48 = vadd.f32 %v3016_v51, %v1229_v47  ;;  %v1231_v49 = vpop.f32.mrb[15].mxu1  ;;  %1543 = vmatmul.mubr.bf16.gmra.mrb[24].mxu0 %v1282_v39  ;;  %v1274_v54 = vmax.f32 %v1258_v43, 0.0  ;;  %v2419_v51 = vld [vmem:[#allocation10 + $0x78] sm:$0xff]  }
 0x2b3   : > { %v1261_v50 = vadd.f32 %v3019_v52, %v1231_v49  ;;  %2101 = vmatpush3.bf16.msra.mxu0 %v2414_v42  ;;  %v1275_v57 = vmax.f32 %v1259_v46, 0.0  ;;  %v1318_v52 = vld [vmem:[%s3145_s15] sm:$0x3]  ;;  %s2569_s15 = scalar_lea.vmem %s2568_s23, 2048 }
 0x2b4   : > { %v1276_v55 = vmax.f32 %v1260_v48, 0.0  ;;  %2102 = vmatprep.subr.bf16.mxu0 %v2415_v45  ;;  %v1323_v3 = vrot.slane %v1318_v52, %v2975_v56  ;;  %v1327_v4 = vrot.slane %v1318_v52, %v2980_v58  ;;  %p2571_p2 = scmp.lt.s32.totalorder %s2569_s15, %s2563_s10 }
 0x2b5   : > { %v1277_v59 = vmax.f32 %v1261_v50, 0.0 }
 0x2b6   : > { %v1284_v60 = vpack.c.bf16 %v1276_v55, %v1274_v54  ;;  %p2572_p13 = por %p2571_p2, %p2570_p1 }
 0x2b7   : > { %v1285_v63 = vpack.c.bf16 %v1277_v59, %v1275_v57  ;;  %2103 = vmatpush3.bf16.msra.mxu0 %v2416_v53 }
 0x2b8   : > { %2104 = vmatprep.subr.bf16.mxu0 %v2417_v0  ;;  %v2067_v0 = vld [vmem:[%s3146_s8] ss:$0 sm:$0xff]  ;;  %p2573_p9 = pnand %p2572_p13, %p2566_p12 }
 0x2b9   : > { %1552 = vmatprep.mubr.bf16.mxu0 %v1285_v63 }
 0x2ba   : > { %1553 = vmatmul.mubr.bf16.gmra.mrb[28].mxu0 %v1284_v60 }
 0x2bb   : > { %2105 = vmatpush3.bf16.msra.mxu0 %v2418_v1 }
 0x2bc   : > { %2106 = vmatprep.subr.bf16.mxu0 %v2419_v51 }
 0x2bf   : > { %2107 = vmatpush3.bf16.msra.mxu0 %v2420_v2 }
 0x375   : > { %v1524_v5 = vpop.f32.mrb[16].mxu0 }
 0x376   : > { %v1525_v6 = vadd.f32 %v1524_v5, %v1323_v3  ;;  %v1526_v7 = vpop.f32.mrb[17].mxu0 }
 0x377   : > { %v1527_v8 = vadd.f32 %v1526_v7, %v1327_v4  ;;  %v1528_v9 = vpop.f32.mrb[18].mxu0 }
 0x378   : > { %v1529_v10 = vadd.f32 %v1528_v9, %v1323_v3  ;;  %v1530_v11 = vpop.f32.mrb[19].mxu0  ;;  %v1563_v13 = vmax.f32 %v1525_v6, 0.0 }
 0x379   : > { %v1531_v12 = vadd.f32 %v1530_v11, %v1327_v4  ;;  %v1564_v15 = vmax.f32 %v1527_v8, 0.0 }
 0x37a   : > { %v1565_v14 = vmax.f32 %v1529_v10, 0.0 }
 0x37b   : > { %v1566_v16 = vmax.f32 %v1531_v12, 0.0 }
 0x37c   : > { %v1579_v17 = vpack.c.bf16 %v1565_v14, %v1563_v13 }
 0x37d   : > { %v1580_v18 = vpack.c.bf16 %v1566_v16, %v1564_v15  ;;  %v1534_v19 = vpop.f32.mrb[20].mxu0 }
 0x37e   : > { %v1535_v20 = vadd.f32 %v1534_v19, %v1323_v3  ;;  %v1536_v21 = vpop.f32.mrb[21].mxu0 }
 0x37f   : > { %v1537_v56 = vadd.f32 %v1536_v21, %v1327_v4  ;;  %v1538_v22 = vpop.f32.mrb[22].mxu0  ;;  %1754 = vmatprep.mubr.bf16.mxu0 %v1580_v18 }
 0x380   : > { %v1539_v58 = vadd.f32 %v1538_v22, %v1323_v3  ;;  %v1540_v61 = vpop.f32.mrb[23].mxu0  ;;  %1755 = vmatmul.mubr.bf16.vlgmr.msra.gmra.mrb[32].mxu0 %v1579_v17  ;;  %v1567_v62 = vmax.f32 %v1535_v20, 0.0 }
 0x381   : > { %v1541_v23 = vadd.f32 %v1540_v61, %v1327_v4  ;;  %v1568_v25 = vmax.f32 %v1537_v56, 0.0 }
 0x382   : > { %v1569_v24 = vmax.f32 %v1539_v58, 0.0 }
 0x383   : > { %v1570_v26 = vmax.f32 %v1541_v23, 0.0 }
 0x384   : > { %v1581_v27 = vpack.c.bf16 %v1569_v24, %v1567_v62 }
 0x385   : > { %v1582_v28 = vpack.c.bf16 %v1570_v26, %v1568_v25  ;;  %v1544_v29 = vpop.f32.mrb[24].mxu0 }
 0x386   : > { %v1545_v30 = vadd.f32 %v1544_v29, %v1323_v3  ;;  %v1546_v31 = vpop.f32.mrb[25].mxu0 }
 0x387   : > { %v1547_v32 = vadd.f32 %v1546_v31, %v1327_v4  ;;  %v1548_v33 = vpop.f32.mrb[26].mxu0  ;;  %1762 = vmatprep.mubr.bf16.mxu0 %v1582_v28 }
 0x388   : > { %v1549_v34 = vadd.f32 %v1548_v33, %v1323_v3  ;;  %v1550_v35 = vpop.f32.mrb[27].mxu0  ;;  %1763 = vmatmul.mubr.bf16.gmra.mrb[36].mxu0 %v1581_v27  ;;  %v1571_v37 = vmax.f32 %v1545_v30, 0.0 }
 0x389   : > { %v1551_v36 = vadd.f32 %v1550_v35, %v1327_v4  ;;  %v1572_v39 = vmax.f32 %v1547_v32, 0.0 }
 0x38a   : > { %v1573_v38 = vmax.f32 %v1549_v34, 0.0 }
 0x38b   : > { %v1574_v40 = vmax.f32 %v1551_v36, 0.0 }
 0x38c   : > { %v1583_v41 = vpack.c.bf16 %v1573_v38, %v1571_v37 }
 0x38d   : > { %v1584_v42 = vpack.c.bf16 %v1574_v40, %v1572_v39  ;;  %v1554_v43 = vpop.f32.mrb[28].mxu0 }
 0x38e   : > { %v1555_v44 = vadd.f32 %v1554_v43, %v1323_v3  ;;  %v1556_v45 = vpop.f32.mrb[29].mxu0 }
 0x38f   : > { %v1557_v46 = vadd.f32 %v1556_v45, %v1327_v4  ;;  %v1558_v47 = vpop.f32.mrb[30].mxu0  ;;  %1770 = vmatprep.mubr.bf16.mxu0 %v1584_v42 }
 0x390   : > { %v1559_v48 = vadd.f32 %v1558_v47, %v1323_v3  ;;  %v1560_v49 = vpop.f32.mrb[31].mxu0  ;;  %1771 = vmatmul.mubr.bf16.gmra.mrb[40].mxu0 %v1583_v41  ;;  %v1575_v53 = vmax.f32 %v1555_v44, 0.0 }
 0x391   : > { %v1561_v50 = vadd.f32 %v1560_v49, %v1327_v4  ;;  %v1576_v55 = vmax.f32 %v1557_v46, 0.0 }
 0x392   : > { %v1577_v54 = vmax.f32 %v1559_v48, 0.0 }
 0x393   : > { %v1578_v57 = vmax.f32 %v1561_v50, 0.0 }
 0x394   : > { %v1585_v59 = vpack.c.bf16 %v1577_v54, %v1575_v53 }
 0x395   : > { %v1586_v60 = vpack.c.bf16 %v1578_v57, %v1576_v55 }
 0x397   : > { %1778 = vmatprep.mubr.bf16.mxu0 %v1586_v60 }
 0x398   : > { %1779 = vmatmul.mubr.bf16.gmra.mrb[44].mxu0 %v1585_v59 }
 0x453   : > { %v2108_v63 = vpop.f32.mrb[32].mxu0 }
 0x454   : > { %v2109_v1 = vpop.f32.mrb[33].mxu0 }
 0x455   : > { %v2110_v51 = vadd.f32 %v2109_v1, %v2108_v63  ;;  %v2111_v2 = vpop.f32.mrb[34].mxu0 }
 0x456   : > { %v2112_v52 = vpop.f32.mrb[35].mxu0 }
 0x457   : > { %v1757_v3 = vadd.f32 %v2110_v51, %v2067_v0  ;;  %v2113_v4 = vadd.f32 %v2112_v52, %v2111_v2 }
 0x459   : > { %1787 = vst [vmem:[%s3047_s22] sm:$0xff] %v1757_v3  ;;  %v1760_v5 = vadd.f32 %v2113_v4, %v2067_v0 }
 0x45b   : > { %1788 = vst [vmem:[%s3047_s22 + $0x8] sm:$0xff] %v1760_v5  ;;  %v2114_v6 = vpop.f32.mrb[36].mxu0 }
 0x45c   : > { %v2115_v7 = vpop.f32.mrb[37].mxu0 }
 0x45d   : > { %v2116_v8 = vadd.f32 %v2115_v7, %v2114_v6  ;;  %v2117_v9 = vpop.f32.mrb[38].mxu0 }
 0x45e   : > { %v2118_v10 = vpop.f32.mrb[39].mxu0 }
 0x45f   : > { %v1765_v11 = vadd.f32 %v2116_v8, %v2067_v0  ;;  %v2119_v12 = vadd.f32 %v2118_v10, %v2117_v9 }
 0x461   : > { %1789 = vst [vmem:[%s3047_s22 + $0x10] sm:$0xff] %v1765_v11  ;;  %v1768_v13 = vadd.f32 %v2119_v12, %v2067_v0 }
 0x463   : > { %1790 = vst [vmem:[%s3047_s22 + $0x18] sm:$0xff] %v1768_v13  ;;  %v2120_v14 = vpop.f32.mrb[40].mxu0 }
 0x464   : > { %v2121_v15 = vpop.f32.mrb[41].mxu0 }
 0x465   : > { %v2122_v16 = vadd.f32 %v2121_v15, %v2120_v14  ;;  %v2123_v17 = vpop.f32.mrb[42].mxu0 }
 0x466   : > { %v2124_v18 = vpop.f32.mrb[43].mxu0 }
 0x467   : > { %v1773_v19 = vadd.f32 %v2122_v16, %v2067_v0  ;;  %v2125_v20 = vadd.f32 %v2124_v18, %v2123_v17 }
 0x469   : > { %1791 = vst [vmem:[%s3047_s22 + $0x20] sm:$0xff] %v1773_v19  ;;  %v1776_v21 = vadd.f32 %v2125_v20, %v2067_v0 }
 0x46b   : > { %1792 = vst [vmem:[%s3047_s22 + $0x28] sm:$0xff] %v1776_v21  ;;  %v2126_v56 = vpop.f32.mrb[44].mxu0 }
 0x46c   : > { %v2127_v22 = vpop.f32.mrb[45].mxu0 }
 0x46d   : > { %v2128_v58 = vadd.f32 %v2127_v22, %v2126_v56  ;;  %v2129_v61 = vpop.f32.mrb[46].mxu0 }
 0x46e   : > { %v2130_v23 = vpop.f32.mrb[47].mxu0 }
 0x46f   : > { %v1781_v62 = vadd.f32 %v2128_v58, %v2067_v0  ;;  %v2131_v24 = vadd.f32 %v2130_v23, %v2129_v61 }
 0x471   : > { %1793 = vst [vmem:[%s3047_s22 + $0x30] sm:$0xff] %v1781_v62  ;;  %v1784_v25 = vadd.f32 %v2131_v24, %v2067_v0 }
 0x473   : > { %1794 = vst [vmem:[%s3047_s22 + $0x38] sm:$0xff] %v1784_v25 }
 0x474   : > { %2576 = shalt.err (!%p2573_p9)
}
 0x475   : > { %s2577_s16 = scalar_lea.hbm %s3062_s24, 1024  ;;  %s2581_s22 = scalar_lea.hbm %s3147_s13, 2048 }
 0x476   : > { %p2578_p0 = scmp.ne.s32.totalorder %s3062_s24, %s2577_s16  ;;  %p2582_p8 = scmp.lt.u32.totalorder %s3062_s24, %s3147_s13 }
 0x477   : > { %p2583_p6 = scmp.lt.u32.totalorder %s2581_s22, %s2577_s16  ;;  %p2585_p5 = scmp.lt.u32.totalorder %s2577_s16, %s3062_s24 }
 0x478   : > { %p2579_p11 = pnand %p2578_p0, %p2883_p3 }
 0x479   : > { %p2584_p10 = por %p2583_p6, %p2582_p8 }
 0x47a   : > { %p2580_p4 = pneg %p2579_p11 }
 0x47b   : > { %p2586_p7 = por %p2585_p5, %p2584_p10 }
 0x47d   : > { %p2587_p12 = pnand %p2586_p7, %p2580_p4 }
 0x47f   : > { %2590 = shalt.err (!%p2587_p12)
}
 0x480   : > { %s2650_s11 = smov 128   ;;  %s2651_s10 = smov 8  }
 0x481   : > { %2166 = dma.vmem_to_hbm [thread:$0]  (%p2883_p3), %s3057_s27, 1024, %s3062_s24, %s1796_s25, %s2650_s11, %s2650_s11, %s2651_s10  }
 0x482 PF: > { %s3148_s21 = sld [smem:[#allocation16_spill]]  ;;  %s3149_s23 = sld [smem:[#allocation17_spill]] }
 0x483   : > { %p3151_p2 = scmp.ge.s32.totalorder %s2637_s20, 2 }
 0x488   : > { %s1824_s15 = sand.u32 1, %s3148_s21   ;;  %p3150_p1 = scmp.ne.s32.totalorder %s3149_s23, 0 }
 0x489   : > { %s1825_s16 = scalar_lea.sflag [#allocation4], %s1824_s15 }
 0x48a   : > { %p2186_p13 = pnand %p3151_p2, %p3150_p1 }
 0x48c   : > { %2620 = dma.done.wait (!%p2186_p13), %s1825_s16, 1024  }
 0x48d   : > { %2622 = vsyncadd (!%p2186_p13), %s1825_s16, 4294966272  ;;  %s3152_s30 = smov %s2870_s17  ;;  %p26_p9 = scmp.ge.s32.totalorder %s2870_s17, 4  }
 0x48e   : > { %s3153_s17 = smov %s2629_s18  ;;  %s3154_s18 = smov %s2633_s19 }
 0x48f   : > { %s3155_s19 = smov %s2879_s29  ;;  %s3156_s20 = smov %s3152_s30 }
 0x490   :  { %28 = sbr.rel (!%p26_p9) target bundleno = 11 (0xb), region = 128 }
 0x497   :  { %1830 = vsyncpa [#allocation3], 1 }
 0x498   :  { %1832 = vsyncpa [#allocation3 + $0x1], 1 }
 0x499   :  { %1833 = vsyncpa [#allocation6], 1 }
 0x49a   :  { %1834 = vsyncpa [#allocation9], 1 }
 0x49b   :  { %1835 = vsyncpa [#allocation4], 1 }
 0x49c   :  { %1837 = vsyncpa [#allocation4 + $0x1], 1 }

// kernel: tpu_custom_call.1
= control target key start
LH: loop header
LB: loop body
LE: loop exit
PB: predicated region body
PF: predicated region fallthrough
CT: control target
= control target key end

     0   :  { %s3108_s0 = inlined_call_operand.hbm [shape: bf16[128,256], index: 0, kind: input, shape index: {}]   ;;  %s3109_s1 = inlined_call_operand.vmem [shape: bf16[128,10], index: 1, kind: input, shape index: {}]   ;;  %s3110_s2 = inlined_call_operand.vmem [shape: bf16[10,256], index: 2, kind: input, shape index: {}]   ;;  %s3111_s3 = inlined_call_operand.vmem [shape: f32[1,256], index: 3, kind: input, shape index: {}]   ;;  %s3112_s4 = inlined_call_operand.hbm [shape: bf16[256,256], index: 4, kind: input, shape index: {}]   ;;  %s3113_s5 = inlined_call_operand.hbm [shape: bf16[256,256], index: 5, kind: input, shape index: {}]   ;;  %s3114_s6 = inlined_call_operand.vmem [shape: f32[1,256], index: 6, kind: input, shape index: {}]   ;;  %s3115_s7 = inlined_call_operand.hbm [shape: bf16[256,256], index: 7, kind: input, shape index: {}]   ;;  %s3116_s8 = inlined_call_operand.vmem [shape: f32[1,256], index: 8, kind: input, shape index: {}]   ;;  %s3117_s9 = inlined_call_operand.hbm [shape: bf16[256,128], index: 9, kind: input, shape index: {}]   ;;  %s3118_s10 = inlined_call_operand.vmem [shape: f32[1,128], index: 10, kind: input, shape index: {}]   ;;  %s3119_s11 = inlined_call_operand.hbm [shape: f32[128,128], index: 11, kind: output, shape index: {}]  }
   0x1   :  { %3126 = sst [smem:[#allocation18_spill]] %s3116_s8 }
   0x2   :  { %3127 = sst [smem:[#allocation19_spill]] %s3118_s10 }
   0x3   :  { %3128 = sst [smem:[#allocation20_spill]] %s3119_s11 }
   0x4   :  { %16 = vsyncpa [#allocation3], 0 }
   0x5   :  { %18 = vsyncpa [#allocation3 + $0x1], 0 }
   0x6   :  { %19 = vsyncpa [#allocation6], 0 }
   0x7   :  { %20 = vsyncpa [#allocation9], 0 }
   0x8   :  { %21 = vsyncpa [#allocation4], 0 }
   0x9   :  { %23 = vsyncpa [#allocation4 + $0x1], 0  ;;  %s2712_s17 = smov 0   ;;  %s2714_s18 = smov 0  }
   0xa   :  { %s2716_s19 = smov 0   ;;  %s2718_s20 = smov 0  }
   0xb LB: > { %3129 = sst [smem:[#allocation16_spill]] %s2625_s17  ;;  %s2733_s21 = sadd.s32 4294967295, %s2637_s20   ;;  %s2637_s20 = sphi %s2718_s20, %s3156_s20   ;;  %s2633_s19 = sphi %s2716_s19, %s3155_s19   ;;  %s2629_s18 = sphi %s2714_s18, %s3154_s18   ;;  %s2625_s17 = sphi %s2712_s17, %s3153_s17  }
   0xc   : > { %s1932_s22 = sadd.s32 4294967294, %s2637_s20   ;;  %p49_p0 = scmp.ne.s32.totalorder %s2629_s18, %s2625_s17 }
   0xd   : > { %p3121_p1 = scmp.eq.s32.totalorder %s2733_s21, 0  ;;  %p294_p3 = scmp.eq.s32.totalorder %s1932_s22, 1 }
   0xe   : > { %p1933_p5 = scmp.ge.s32.totalorder %s2637_s20, 1  ;;  %p301_p7 = scmp.lt.s32.totalorder %s2637_s20, 3 }
   0xf   : > { %p2742_p4 = por %p3121_p1, %p49_p0  ;;  %p2747_p6 = por %p294_p3, %p49_p0 }
  0x10   : > { %p2752_p8 = pnand %p1933_p5, %p301_p7  ;;  %s2639_s26 = smov [#allocation5]  }
  0x11   : > { %s3130_s23 = scalar_select %p2742_p4, 1, 0 }
  0x12   : > { %s3131_s24 = scalar_select %p2747_p6, 1, 0 }
  0x13   : > { %s3133_s25 = scalar_select %p2752_p8, 1, 0 }
  0x14   : > { %3132 = sst [smem:[#allocation17_spill]] %s3131_s24  ;;  %s319_s27 = sshll.u32 %s2639_s26, 4  ;;  %s2756_s27 = int_to_ptr.vmem [resolvable:$true] %s319_s27 }
  0x15   : > { %p2168_p9 = pneg %p2752_p8  ;;  %s2640_s29 = smov [#allocation8]  }
  0x16   : > { %s348_s30 = sshll.u32 %s2640_s29, 4  ;;  %s2641_s12 = smov [#allocation7]   ;;  %s2767_s30 = int_to_ptr.vmem [resolvable:$true] %s348_s30 }
  0x17   : > { %p2763_p11 = pnand %p2168_p9, %p3121_p1  ;;  %s2769_s13 = sshll.u32 %s2641_s12, 4  ;;  %s333_s13 = int_to_ptr.vmem [resolvable:$true] %s2769_s13 }
  0x18   : > { %s2421_s16 = scalar_lea.hbm %s3112_s4, 4096 }
  0x19   : > { %p2422_p12 = scmp.ne.s32.totalorder %s3112_s4, %s2421_s16  ;;  %p2779_p13 = pneg %p2763_p11 }
  0x1a   : > { %p2428_p5 = scmp.lt.u32.totalorder %s2421_s16, %s3112_s4 }
  0x1b   : > { %p2424_p0 = pnand %p2779_p13, %p2422_p12 }
  0x1d   : > { %p2425_p3 = pneg %p2424_p0 }
  0x1f   : > { %p2430_p7 = pnand %p2428_p5, %p2425_p3 }
  0x21   : > { %2433 = shalt.err (!%p2430_p7)
}
  0x22   : > { %s2434_s14 = scalar_lea.vmem %s2756_s27, 4096  ;;  %p2442_p2 = scmp.lt.s32.totalorder %s2756_s27, %s2756_s27 }
  0x23   : > { %p2435_p9 = scmp.ne.s32.totalorder %s2756_s27, %s2434_s14  ;;  %p2443_p6 = scmp.lt.s32.totalorder %s2434_s14, %s2434_s14 }
  0x25   : > { %p2437_p10 = pnand %p2435_p9, %p2779_p13  ;;  %p2444_p12 = por %p2443_p6, %p2442_p2 }
  0x27   : > { %p2438_p1 = pneg %p2437_p10 }
  0x29   : > { %p2445_p0 = pnand %p2444_p12, %p2438_p1 }
  0x2b   : > { %2448 = shalt.err (!%p2445_p0)
}
  0x2c   : > { %s2642_s15 = smov 128   ;;  %s2643_s16 = smov 8  }
  0x2d   : > { %2171 = dma.hbm_to_vmem [thread:$0]  (!%p2763_p11), %s3112_s4, 4096, %s2756_s27, [#allocation6], %s2642_s15, %s2642_s15, %s2643_s16  }
  0x2e   : > { %s2449_s14 = scalar_lea.hbm %s3115_s7, 4096 }
  0x2f   : > { %p2450_p1 = scmp.ne.s32.totalorder %s3115_s7, %s2449_s14  ;;  %p2456_p10 = scmp.lt.u32.totalorder %s2449_s14, %s3115_s7 }
  0x31   : > { %p2452_p2 = pnand %p2450_p1, %p2779_p13 }
  0x33   : > { %p2453_p6 = pneg %p2452_p2 }
  0x35   : > { %p2458_p3 = pnand %p2456_p10, %p2453_p6 }
  0x37   : > { %2461 = shalt.err (!%p2458_p3)
}
  0x38   : > { %s2462_s27 = scalar_lea.vmem %s2767_s30, 4096  ;;  %p2470_p12 = scmp.lt.s32.totalorder %s2767_s30, %s2767_s30 }
  0x39   : > { %p2463_p5 = scmp.ne.s32.totalorder %s2767_s30, %s2462_s27  ;;  %p2471_p0 = scmp.lt.s32.totalorder %s2462_s27, %s2462_s27 }
  0x3b   : > { %p2465_p7 = pnand %p2463_p5, %p2779_p13  ;;  %p2472_p1 = por %p2471_p0, %p2470_p12 }
  0x3d   : > { %p2466_p9 = pneg %p2465_p7 }
  0x3f   : > { %p2473_p2 = pnand %p2472_p1, %p2466_p9 }
  0x41   : > { %2476 = shalt.err (!%p2473_p2)
}
  0x42   : > { %2177 = dma.hbm_to_vmem [thread:$0]  (!%p2763_p11), %s3115_s7, 4096, %s2767_s30, [#allocation9], %s2642_s15, %s2642_s15, %s2643_s16  }
  0x43   : > { %s2477_s22 = scalar_lea.hbm %s3113_s5, 4096 }
  0x44   : > { %p2478_p6 = scmp.ne.s32.totalorder %s3113_s5, %s2477_s22  ;;  %p2484_p5 = scmp.lt.u32.totalorder %s2477_s22, %s3113_s5 }
  0x46   : > { %p2480_p10 = pnand %p2478_p6, %p2779_p13 }
  0x48   : > { %p2481_p3 = pneg %p2480_p10 }
  0x4a   : > { %p2486_p7 = pnand %p2484_p5, %p2481_p3 }
  0x4c   : > { %2489 = shalt.err (!%p2486_p7)
}
  0x4d   : > { %s2490_s27 = scalar_lea.vmem %s333_s13, 4096  ;;  %p2498_p1 = scmp.lt.s32.totalorder %s333_s13, %s333_s13 }
  0x4e   : > { %p2491_p9 = scmp.ne.s32.totalorder %s333_s13, %s2490_s27  ;;  %p2499_p2 = scmp.lt.s32.totalorder %s2490_s27, %s2490_s27 }
  0x50   : > { %p2493_p12 = pnand %p2491_p9, %p2779_p13  ;;  %p2500_p4 = por %p2499_p2, %p2498_p1 }
  0x52   : > { %p2494_p0 = pneg %p2493_p12 }
  0x54   : > { %p2501_p8 = pnand %p2500_p4, %p2494_p0 }
  0x56   : > { %2504 = shalt.err (!%p2501_p8)
}
  0x57   : > { %2174 = dma.hbm_to_vmem [thread:$0]  (!%p2763_p11), %s3113_s5, 4096, %s333_s13, [#allocation6], %s2642_s15, %s2642_s15, %s2643_s16  }
  0x58   : > { %s2644_s10 = smov [#allocation10]   ;;  %s2505_s26 = scalar_lea.hbm %s3117_s9, 2048 }
  0x59   : > { %s364_s11 = sshll.u32 %s2644_s10, 4  ;;  %p2506_p4 = scmp.ne.s32.totalorder %s3117_s9, %s2505_s26  ;;  %s365_s11 = int_to_ptr.vmem [resolvable:$true] %s364_s11 }
  0x5a   : > { %p2512_p10 = scmp.lt.u32.totalorder %s2505_s26, %s3117_s9 }
  0x5b   : > { %p2508_p8 = pnand %p2506_p4, %p2779_p13 }
  0x5d   : > { %p2509_p6 = pneg %p2508_p8 }
  0x5f   : > { %p2514_p3 = pnand %p2512_p10, %p2509_p6 }
  0x61   : > { %2517 = shalt.err (!%p2514_p3)
}
  0x62   : > { %s2518_s13 = scalar_lea.vmem %s365_s11, 2048  ;;  %p2526_p12 = scmp.lt.s32.totalorder %s365_s11, %s365_s11 }
  0x63   : > { %p2519_p5 = scmp.ne.s32.totalorder %s365_s11, %s2518_s13  ;;  %p2527_p0 = scmp.lt.s32.totalorder %s2518_s13, %s2518_s13 }
  0x65   : > { %p2521_p7 = pnand %p2519_p5, %p2779_p13  ;;  %p2528_p1 = por %p2527_p0, %p2526_p12 }
  0x67   : > { %p2522_p9 = pneg %p2521_p7 }
  0x69   : > { %p2529_p2 = pnand %p2528_p1, %p2522_p9 }
  0x6b   : > { %2532 = shalt.err (!%p2529_p2)
}
  0x6c   : > { %s2645_s30 = smov 64   ;;  %s2646_s24 = smov 4  }
  0x6d   : > { %2180 = dma.hbm_to_vmem [thread:$0]  (!%p2763_p11), %s3117_s9, 2048, %s365_s11, [#allocation9], %s2645_s30, %s2645_s30, %s2646_s24  }
  0x6e   : > { %s2870_s17 = sadd.s32 1, %s2637_s20   ;;  %s36_s26 = sadd.s32 1, %s2633_s19 }
  0x6f   : > { %s33_s22 = ssub.s32 %s2637_s20, %s2870_s17  ;;  %p43_p4 = scmp.ne.s32.totalorder %s2633_s19, %s2629_s18 }
  0x70   : > { %p34_p13 = scmp.eq.s32.totalorder %s33_s22, 0  ;;  %p44_p8 = scmp.eq.s32.totalorder %s2637_s20, 0 }
  0x71   : > { %p3136_p10 = scmp.eq.s32.totalorder %s2733_s21, 1  ;;  %p2193_p5 = scmp.lt.s32.totalorder %s2637_s20, 2 }
  0x72   : > { %s2879_s29 = scalar_select %p34_p13, %s2633_s19, %s36_s26  }
  0x73   : > { %p45_p6 = por %p44_p8, %p43_p4  ;;  %p2883_p3 = por %p3136_p10, %p43_p4 }
  0x74   : > { %s381_s28 = sand.u32 1, %s2633_s19   ;;  %s2090_s11 = sshll.u32 %s2637_s20, 10 }
  0x75   : > { %s1939_s14 = sshll.u32 %s381_s28, 6  ;;  %s2893_s30 = scalar_lea.hbm %s3108_s0, %s2090_s11 }
  0x76   : > { %s385_s24 = scalar_lea.vmem [#allocation2], %s1939_s14  ;;  %p2897_p11 = pnand %p2193_p5, %p45_p6 }
  0x77   : > { %s393_s8 = sshll.u32 %s385_s24, 4  ;;  %s2901_s22 = scalar_lea.sflag [#allocation3], %s381_s28  ;;  %s2895_s8 = int_to_ptr.vmem [resolvable:$true] %s393_s8 }
  0x78   : > { %s2533_s26 = scalar_lea.hbm %s2893_s30, 1024  ;;  %p2535_p9 = pneg %p2897_p11 }
  0x79   : > { %p2534_p7 = scmp.ne.s32.totalorder %s2893_s30, %s2533_s26  ;;  %s2538_s27 = scalar_lea.hbm %s3108_s0, 2048 }
  0x7a   : > { %p2539_p1 = scmp.lt.u32.totalorder %s2893_s30, %s3108_s0  ;;  %p2540_p2 = scmp.lt.u32.totalorder %s2538_s27, %s2533_s26 }
  0x7b   : > { %p2536_p12 = pnand %p2535_p9, %p2534_p7  ;;  %p2542_p4 = scmp.lt.u32.totalorder %s2533_s26, %s2893_s30 }
  0x7c   : > { %p2541_p13 = por %p2540_p2, %p2539_p1 }
  0x7d   : > { %p2537_p0 = pneg %p2536_p12 }
  0x7e   : > { %p2543_p8 = por %p2542_p4, %p2541_p13 }
  0x80   : > { %p2544_p6 = pnand %p2543_p8, %p2537_p0 }
  0x82   : > { %2547 = shalt.err (!%p2544_p6)
}
  0x83   : > { %s2548_s28 = scalar_lea.vmem %s2895_s8, 1024  ;;  %s2647_s14 = smov [#allocation2]  }
  0x84   : > { %p2549_p10 = scmp.ne.s32.totalorder %s2895_s8, %s2548_s28  ;;  %s2553_s11 = sshll.u32 %s2647_s14, 4  ;;  %s2554_s11 = int_to_ptr.vmem [resolvable:$false] %s2553_s11 }
  0x85   : > { %s2555_s13 = scalar_lea.vmem %s2554_s11, 2048  ;;  %p2556_p12 = scmp.lt.s32.totalorder %s2895_s8, %s2554_s11 }
  0x86   : > { %p2551_p5 = pnand %p2549_p10, %p2535_p9  ;;  %p2557_p1 = scmp.lt.s32.totalorder %s2555_s13, %s2548_s28 }
  0x88   : > { %p2552_p7 = pneg %p2551_p5  ;;  %p2558_p2 = por %p2557_p1, %p2556_p12 }
  0x8a   : > { %p2559_p13 = pnand %p2558_p2, %p2552_p7 }
  0x8c   : > { %2562 = shalt.err (!%p2559_p13)
}
  0x8d   : > { %2184 = dma.hbm_to_vmem [thread:$0]  (!%p2897_p11), %s2893_s30, 1024, %s2895_s8, %s2901_s22, %s2642_s15, %s2642_s15, %s2643_s16  }
  0x8e   : > { %p3139_p9 = scmp.ne.s32.totalorder %s3133_s25, 0 }
  0x8f   : > { %s2935_s26 = sand.u32 (!%p3139_p9), 1, %s2629_s18   ;;  %p3140_p0 = scmp.ne.s32.totalorder (!%p3139_p9), %s3130_s23, 0 }
  0x90   : > { %414 = sbr.rel (%p3139_p9) target bundleno = 1154 (0x482), region = 64  ;;  %s1944_s27 = sshll.u32 (!%p3139_p9), %s2935_s26, 6 }
  0x91   : > { %s417_s24 = scalar_lea.sflag (!%p3139_p9), [#allocation3], %s2935_s26  ;;  %s2941_s10 = scalar_lea.vmem (!%p3139_p9), [#allocation2], %s1944_s27 }
  0x97   : > { %2608 = dma.done.wait (%p3140_p0), %s417_s24, 1024  }
  0x98   : > { %2610 = vsyncadd (%p3140_p0), %s417_s24, 4294966272  ;;  %p3141_p11 = scmp.eq.s32.totalorder %s2733_s21, 0 }
  0x9a   : > { %2612 = dma.done.wait (%p3141_p11), [#allocation6], 8192   ;;  %p3142_p4 = pmov %p3141_p11 }
  0x9c   : > { %2614 = vsyncadd (%p3142_p4), [#allocation6], 4294959104  ;;  %p3143_p8 = pmov %p3142_p4 }
  0x9d   : > { %p3144_p6 = pmov %p3142_p4 }
  0x9e   : > { %2616 = dma.done.wait (%p3143_p8), [#allocation9], 6144  }
  0x9f   : > { %2618 = vsyncadd (%p3144_p6), [#allocation9], 4294961152  ;;  %s1950_s25 = sshll.u32 %s2733_s21, 3  ;;  %v2648_v0 = vmov 0   ;;  %vm552_vm0 = vcmask 1044480   ;;  %vm539_vm1 = vcmask 80896   ;;  %v501_v50 = vlaneseq }
  0xa0   : > { %591 = vmatprep.mubr.bf16.mxu0 %v2648_v0  ;;  %p482_p10 = scmp.lt.s32.totalorder %s1950_s25, 15  ;;  %v2242_v1 = vld [vmem:[%s3110_s2 + $0x4] ss:$8 sps:$4 sm:$0x1f]   ;;  %v2251_v6 = vld [vmem:[#allocation7] ss:$8 sps:$4 sm:$0xff]  }
  0xa1   : > { %v2244_v2 = vld [vmem:[%s3110_s2] ss:$8 sps:$4 sm:$0x1f]   ;;  %1958 = vmatprep.subr.msk.bf16.mxu0 %vm552_vm0, %v2242_v1  ;;  %v2249_v5 = vld [vmem:[#allocation7 + $0x4] ss:$8 sps:$4 sm:$0xff]   ;;  %v502_v53 = vshrl.u32 %v501_v50, 7 }
  0xa2   : > { %s3158_s25 = smov (!%p482_p10, %s1950_s25), 15  ;;  %v554_v3 = vsel %vm552_vm0, %v2244_v2, 0  ;;  %v2252_v7 = vld [vmem:[#allocation7 + $0x14] ss:$8 sps:$4 sm:$0xff]   ;;  %888 = vmatprep.subr.bf16.mxu1 %v2249_v5  ;;  %v2254_v8 = vld [vmem:[#allocation7 + $0x10] ss:$8 sps:$4 sm:$0xff]  }
  0xa3   : > { %s1951_s23 = sshll.u32 %s3158_s25, 2  ;;  %560 = vmatpush1.bf16.msra.mxu0 %v554_v3  ;;  %889 = vmatpush1.bf16.msra.mxu1 %v2251_v6  ;;  %v2255_v9 = vld [vmem:[#allocation7 + $0x24] ss:$8 sps:$4 sm:$0xff]   ;;  %v2257_v11 = vld [vmem:[#allocation7 + $0x20] ss:$8 sps:$4 sm:$0xff]   ;;  %v2975_v56 = vsub.s32 0, %v502_v53 }
  0xa4   : > { %s2962_s22 = scalar_lea.vmem %s3109_s1, %s1951_s23  ;;  %890 = vmatprep.subr.bf16.mxu1 %v2252_v7  ;;  %v2258_v12 = vld [vmem:[#allocation7 + $0x34] ss:$8 sps:$4 sm:$0xff]   ;;  %v2260_v13 = vld [vmem:[#allocation7 + $0x30] ss:$8 sps:$4 sm:$0xff]   ;;  %v2261_v14 = vld [vmem:[#allocation7 + $0x44] ss:$8 sps:$4 sm:$0xff]  }
  0xa5   : > { %v2245_v4 = vld [vmem:[%s2962_s22] sm:$0xff]   ;;  %v2246_v10 = vld [vmem:[%s2962_s22 + $0x8] sm:$0xff]   ;;  %v2247_v15 = vld [vmem:[%s2962_s22 + $0x10] sm:$0xff]   ;;  %v2980_v58 = vsub.s32 1, %v502_v53  ;;  %s3145_s15 = sld [smem:[#allocation18_spill]]  ;;  %s3146_s8 = sld [smem:[#allocation19_spill]] }
  0xa6   : > { %1959 = vmatmul.mubr.msk.bf16.vlgmr.msra.gmra.mrb[0].mxu0 %vm539_vm1, %v2245_v4  ;;  %v2263_v16 = vld [vmem:[#allocation7 + $0x40] ss:$8 sps:$4 sm:$0xff]   ;;  %v2264_v17 = vld [vmem:[#allocation7 + $0x54] ss:$8 sps:$4 sm:$0xff]   ;;  %v2266_v18 = vld [vmem:[#allocation7 + $0x50] ss:$8 sps:$4 sm:$0xff]  }
  0xa7   : > { %601 = vmatprep.mubr.bf16.mxu0 %v2648_v0  ;;  %891 = vmatpush1.bf16.msra.mxu1 %v2254_v8  ;;  %v2267_v19 = vld [vmem:[#allocation7 + $0x64] ss:$8 sps:$4 sm:$0xff]   ;;  %v2248_v20 = vld [vmem:[%s2962_s22 + $0x18] sm:$0xff]   ;;  %v2269_v21 = vld [vmem:[#allocation7 + $0x60] ss:$8 sps:$4 sm:$0xff]   ;;  %s3047_s22 = scalar_lea.vmem [#allocation11], %s1944_s27 }
  0xa8   : > { %892 = vmatprep.subr.bf16.mxu1 %v2255_v9  ;;  %v2270_v22 = vld [vmem:[#allocation7 + $0x74] ss:$8 sps:$4 sm:$0xff]   ;;  %v2272_v23 = vld [vmem:[#allocation7 + $0x70] ss:$8 sps:$4 sm:$0xff]   ;;  %v2273_v24 = vld [vmem:[#allocation7 + $0x84] ss:$8 sps:$4 sm:$0xff]  }
  0xa9   : > { %v2275_v25 = vld [vmem:[#allocation7 + $0x80] ss:$8 sps:$4 sm:$0xff]   ;;  %v2276_v26 = vld [vmem:[#allocation7 + $0x94] ss:$8 sps:$4 sm:$0xff]   ;;  %v2278_v27 = vld [vmem:[#allocation7 + $0x90] ss:$8 sps:$4 sm:$0xff]  }
  0xaa   : > { %v2279_v28 = vld [vmem:[#allocation7 + $0xa4] ss:$8 sps:$4 sm:$0xff]   ;;  %v2281_v29 = vld [vmem:[#allocation7 + $0xa0] ss:$8 sps:$4 sm:$0xff]   ;;  %v2282_v30 = vld [vmem:[#allocation7 + $0xb4] ss:$8 sps:$4 sm:$0xff]  }
  0xab   : > { %893 = vmatpush1.bf16.msra.mxu1 %v2257_v11  ;;  %v2284_v31 = vld [vmem:[#allocation7 + $0xb0] ss:$8 sps:$4 sm:$0xff]   ;;  %v2285_v32 = vld [vmem:[#allocation7 + $0xc4] ss:$8 sps:$4 sm:$0xff]   ;;  %v2287_v33 = vld [vmem:[#allocation7 + $0xc0] ss:$8 sps:$4 sm:$0xff]  }
  0xac   : > { %894 = vmatprep.subr.bf16.mxu1 %v2258_v12  ;;  %v2288_v34 = vld [vmem:[#allocation7 + $0xd4] ss:$8 sps:$4 sm:$0xff]   ;;  %v2290_v35 = vld [vmem:[#allocation7 + $0xd0] ss:$8 sps:$4 sm:$0xff]   ;;  %v2291_v36 = vld [vmem:[#allocation7 + $0xe4] ss:$8 sps:$4 sm:$0xff]  }
  0xad   : > { %v2293_v37 = vld [vmem:[#allocation7 + $0xe0] ss:$8 sps:$4 sm:$0xff]   ;;  %v2294_v38 = vld [vmem:[#allocation7 + $0xf4] ss:$8 sps:$4 sm:$0xff]   ;;  %v2296_v39 = vld [vmem:[#allocation7 + $0xf0] ss:$8 sps:$4 sm:$0xff]  }
  0xae   : > { %1960 = vmatmul.mubr.msk.bf16.gmra.mrb[4].mxu0 %vm539_vm1, %v2246_v10  ;;  %v2299_v40 = vld [vmem:[#allocation5 + $0x4] ss:$8 sps:$4 sm:$0xff]   ;;  %v2357_v41 = vld [vmem:[#allocation8] ss:$8 sps:$4 sm:$0xff]   ;;  %v2362_v43 = vld [vmem:[#allocation8 + $0x14] ss:$8 sps:$4 sm:$0xff]  }
  0xaf   : > { %611 = vmatprep.mubr.bf16.mxu0 %v2648_v0  ;;  %895 = vmatpush1.bf16.msra.mxu1 %v2260_v13  ;;  %v2359_v42 = vld [vmem:[#allocation8 + $0x4] ss:$8 sps:$4 sm:$0xff]   ;;  %v2360_v44 = vld [vmem:[#allocation8 + $0x10] ss:$8 sps:$4 sm:$0xff]   ;;  %v2363_v46 = vld [vmem:[#allocation8 + $0x20] ss:$8 sps:$4 sm:$0xff]  }
  0xb0   : > { %896 = vmatprep.subr.bf16.mxu1 %v2261_v14  ;;  %1490 = vmatprep.subr.bf16.mxu0 %v2359_v42  ;;  %v2365_v45 = vld [vmem:[#allocation8 + $0x24] ss:$8 sps:$4 sm:$0xff]   ;;  %v2368_v47 = vld [vmem:[#allocation8 + $0x34] ss:$8 sps:$4 sm:$0xff]   ;;  %v2366_v48 = vld [vmem:[#allocation8 + $0x30] ss:$8 sps:$4 sm:$0xff]  }
  0xb1   : > { %1491 = vmatpush1.bf16.msra.mxu0 %v2357_v41  ;;  %v2371_v49 = vld [vmem:[#allocation8 + $0x44] ss:$8 sps:$4 sm:$0xff]   ;;  %v2369_v51 = vld [vmem:[#allocation8 + $0x40] ss:$8 sps:$4 sm:$0xff]   ;;  %v2374_v52 = vld [vmem:[#allocation8 + $0x54] ss:$8 sps:$4 sm:$0xff]  }
  0xb2   : > { %1492 = vmatprep.subr.bf16.mxu0 %v2362_v43  ;;  %v2372_v54 = vld [vmem:[#allocation8 + $0x50] ss:$8 sps:$4 sm:$0xff]   ;;  %v2377_v55 = vld [vmem:[#allocation8 + $0x64] ss:$8 sps:$4 sm:$0xff]   ;;  %v499_v57 = vld [vmem:[%s3111_s3] sm:$0x3] }
  0xb3   : > { %897 = vmatpush1.bf16.msra.mxu1 %v2263_v16  ;;  %v2375_v59 = vld [vmem:[#allocation8 + $0x60] ss:$8 sps:$4 sm:$0xff]   ;;  %v2380_v60 = vld [vmem:[#allocation8 + $0x74] ss:$8 sps:$4 sm:$0xff]   ;;  %v2983_v61 = vrot.slane %v499_v57, %v2975_v56  ;;  %v2986_v62 = vrot.slane %v499_v57, %v2980_v58  ;;  %v2378_v63 = vld [vmem:[#allocation8 + $0x70] ss:$8 sps:$4 sm:$0xff]  }
  0xb4   : > { %898 = vmatprep.subr.bf16.mxu1 %v2264_v17  ;;  %v2381_v6 = vld [vmem:[#allocation8 + $0x80] ss:$8 sps:$4 sm:$0xff]   ;;  %v2386_v9 = vld [vmem:[#allocation8 + $0x94] ss:$8 sps:$4 sm:$0xff]   ;;  %v2389_v17 = vld [vmem:[#allocation8 + $0xa4] ss:$8 sps:$4 sm:$0xff]  }
  0xb5   : > { %1493 = vmatpush1.bf16.msra.mxu0 %v2360_v44  ;;  %v2308_v43 = vld [vmem:[#allocation5 + $0x34] ss:$8 sps:$4 sm:$0xff]   ;;  %v2306_v53 = vld [vmem:[#allocation5 + $0x30] ss:$8 sps:$4 sm:$0xff]   ;;  %v2311_v57 = vld [vmem:[#allocation5 + $0x44] ss:$8 sps:$4 sm:$0xff]  }
  0xb6   : > { %1961 = vmatmul.mubr.msk.bf16.gmra.mrb[8].mxu0 %vm539_vm1, %v2247_v15  ;;  %1494 = vmatprep.subr.bf16.mxu0 %v2365_v45  ;;  %v2384_v15 = vld [vmem:[#allocation8 + $0x90] ss:$8 sps:$4 sm:$0xff]   ;;  %s1809_s27 = sshll.u32 %s3047_s22, 4  ;;  %s2091_s28 = sshll.u32 %s2733_s21, 10  ;;  %s3057_s27 = int_to_ptr.vmem [resolvable:$true] %s1809_s27 }
  0xb7   : > { %621 = vmatprep.mubr.bf16.mxu0 %v2648_v0  ;;  %899 = vmatpush1.bf16.msra.mxu1 %v2266_v18  ;;  %v2383_v0 = vld [vmem:[#allocation8 + $0x84] ss:$8 sps:$4 sm:$0xff]   ;;  %s3147_s13 = sld [smem:[#allocation20_spill]]  ;;  %s1796_s25 = scalar_lea.sflag [#allocation4], %s2935_s26 }
  0xb8   : > { %900 = vmatprep.subr.bf16.mxu1 %v2267_v19  ;;  %v2297_v19 = vld [vmem:[#allocation5] ss:$8 sps:$4 sm:$0xff]   ;;  %s2649_s21 = smov [#allocation11]  }
  0xb9   : > { %1495 = vmatpush1.bf16.msra.mxu0 %v2363_v46  ;;  %s2567_s23 = sshll.u32 %s2649_s21, 4  ;;  %s2568_s23 = int_to_ptr.vmem [resolvable:$false] %s2567_s23 }
  0xba   : > { %1496 = vmatprep.subr.bf16.mxu0 %v2368_v47  ;;  %p2570_p1 = scmp.lt.s32.totalorder %s3057_s27, %s2568_s23 }
  0xbb   : > { %901 = vmatpush1.bf16.msra.mxu1 %v2269_v21  ;;  %v2302_v21 = vld [vmem:[#allocation5 + $0x14] ss:$8 sps:$4 sm:$0xff]  }
  0xbc   : > { %902 = vmatprep.subr.bf16.mxu1 %v2270_v22 }
  0xbd   : > { %1497 = vmatpush1.bf16.msra.mxu0 %v2366_v48  ;;  %v2393_v48 = vld [vmem:[#allocation8 + $0xc0] ss:$8 sps:$4 sm:$0xff]   ;;  %s3062_s24 = scalar_lea.hbm %s3147_s13, %s2091_s28 }
  0xbe   : > { %1962 = vmatmul.mubr.msk.bf16.gmra.mrb[12].mxu0 %vm539_vm1, %v2248_v20  ;;  %1498 = vmatprep.subr.bf16.mxu0 %v2371_v49 }
  0xbf   : > { %903 = vmatpush1.bf16.msra.mxu1 %v2272_v23 }
  0xc0   : > { %904 = vmatprep.subr.bf16.mxu1 %v2273_v24 }
  0xc1   : > { %1499 = vmatpush1.bf16.msra.mxu0 %v2369_v51 }
  0xc2   : > { %1500 = vmatprep.subr.bf16.mxu0 %v2374_v52  ;;  %v2398_v52 = vld [vmem:[#allocation8 + $0xd4] ss:$8 sps:$4 sm:$0xff]  }
  0xc3   : > { %905 = vmatpush1.bf16.msra.mxu1 %v2275_v25 }
  0xc4   : > { %906 = vmatprep.subr.bf16.mxu1 %v2276_v26  ;;  %v2387_v26 = vld [vmem:[#allocation8 + $0xa0] ss:$8 sps:$4 sm:$0xff]  }
  0xc5   : > { %1501 = vmatpush1.bf16.msra.mxu0 %v2372_v54 }
  0xc6   : > { %1502 = vmatprep.subr.bf16.mxu0 %v2377_v55 }
  0xc7   : > { %907 = vmatpush1.bf16.msra.mxu1 %v2278_v27 }
  0xc8   : > { %908 = vmatprep.subr.bf16.mxu1 %v2279_v28 }
  0xc9   : > { %1503 = vmatpush1.bf16.msra.mxu0 %v2375_v59 }
  0xca   : > { %1504 = vmatprep.subr.bf16.mxu0 %v2380_v60 }
  0xcb   : > { %909 = vmatpush1.bf16.msra.mxu1 %v2281_v29 }
  0xcc   : > { %910 = vmatprep.subr.bf16.mxu1 %v2282_v30  ;;  %v2392_v30 = vld [vmem:[#allocation8 + $0xb4] ss:$8 sps:$4 sm:$0xff]  }
  0xcd   : > { %1505 = vmatpush1.bf16.msra.mxu0 %v2378_v63  ;;  %v2396_v63 = vld [vmem:[#allocation8 + $0xd0] ss:$8 sps:$4 sm:$0xff]  }
  0xce   : > { %1506 = vmatprep.subr.bf16.mxu0 %v2383_v0 }
  0xcf   : > { %911 = vmatpush1.bf16.msra.mxu1 %v2284_v31  ;;  %v2300_v31 = vld [vmem:[#allocation5 + $0x10] ss:$8 sps:$4 sm:$0xff]  }
  0xd0   : > { %912 = vmatprep.subr.bf16.mxu1 %v2285_v32 }
  0xd1   : > { %1507 = vmatpush1.bf16.msra.mxu0 %v2381_v6 }
  0xd2   : > { %1508 = vmatprep.subr.bf16.mxu0 %v2386_v9 }
  0xd3   : > { %913 = vmatpush1.bf16.msra.mxu1 %v2287_v33 }
  0xd4   : > { %914 = vmatprep.subr.bf16.mxu1 %v2288_v34  ;;  %v2305_v34 = vld [vmem:[#allocation5 + $0x24] ss:$8 sps:$4 sm:$0xff]  }
  0xd5   : > { %1509 = vmatpush1.bf16.msra.mxu0 %v2384_v15  ;;  %v2317_v15 = vld [vmem:[#allocation5 + $0x64] ss:$8 sps:$4 sm:$0xff]  }
  0xd6   : > { %1510 = vmatprep.subr.bf16.mxu0 %v2389_v17 }
  0xd7   : > { %915 = vmatpush1.bf16.msra.mxu1 %v2290_v35 }
  0xd8   : > { %916 = vmatprep.subr.bf16.mxu1 %v2291_v36 }
  0xd9   : > { %1511 = vmatpush1.bf16.msra.mxu0 %v2387_v26  ;;  %v2329_v26 = vld [vmem:[#allocation5 + $0xa4] ss:$8 sps:$4 sm:$0xff]  }
  0xda   : > { %1512 = vmatprep.subr.bf16.mxu0 %v2392_v30  ;;  %v2335_v30 = vld [vmem:[#allocation5 + $0xc4] ss:$8 sps:$4 sm:$0xff]  }
  0xdb   : > { %917 = vmatpush1.bf16.msra.mxu1 %v2293_v37  ;;  %v2390_v37 = vld [vmem:[#allocation8 + $0xb0] ss:$8 sps:$4 sm:$0xff]  }
  0xdc   : > { %918 = vmatprep.subr.bf16.mxu1 %v2294_v38 }
  0xdd   : > { %1513 = vmatpush1.bf16.msra.mxu0 %v2390_v37  ;;  %v2342_v37 = vld [vmem:[#allocation5 + $0xf0] ss:$8 sps:$4 sm:$0xff]  }
  0xdf   : > { %919 = vmatpush1.bf16.msra.mxu1 %v2296_v39  ;;  %v2395_v39 = vld [vmem:[#allocation8 + $0xc4] ss:$8 sps:$4 sm:$0xff]  }
  0xe0   : > { %1161 = vmatprep.subr.bf16.mxu1 %v2299_v40  ;;  %v2303_v40 = vld [vmem:[#allocation5 + $0x20] ss:$8 sps:$4 sm:$0xff]   ;;  %1514 = vmatprep.subr.bf16.mxu0 %v2395_v39  ;;  %v2348_v39 = vld [vmem:[%s2941_s10 + $0x14] ss:$8 sps:$4 sm:$0xff]  }
  0xe1   : > { %1515 = vmatpush1.bf16.msra.mxu0 %v2393_v48  ;;  %v2402_v48 = vld [vmem:[#allocation8 + $0xf0] ss:$8 sps:$4 sm:$0xff]  }
  0xe2   : > { %1516 = vmatprep.subr.bf16.mxu0 %v2398_v52 }
  0xe5   : > { %1517 = vmatpush1.bf16.msra.mxu0 %v2396_v63 }
 0x179   : > { %v593_v1 = vpop.f32.mrb[0].mxu0 }
 0x17a   : > { %v594_v2 = vadd.f32 %v593_v1, %v2983_v61  ;;  %v595_v3 = vpop.f32.mrb[1].mxu0  ;;  %v2309_v1 = vld [vmem:[#allocation5 + $0x40] ss:$8 sps:$4 sm:$0xff]  }
 0x17b   : > { %v596_v4 = vadd.f32 %v595_v3, %v2986_v62  ;;  %v597_v5 = vpop.f32.mrb[2].mxu0 }
 0x17c   : > { %v598_v7 = vadd.f32 %v597_v5, %v2983_v61  ;;  %v599_v8 = vpop.f32.mrb[3].mxu0  ;;  %v632_v11 = vmax.f32 %v594_v2, 0.0 }
 0x17d   : > { %v600_v10 = vadd.f32 %v599_v8, %v2986_v62  ;;  %v633_v13 = vmax.f32 %v596_v4, 0.0  ;;  %v2314_v4 = vld [vmem:[#allocation5 + $0x54] ss:$8 sps:$4 sm:$0xff]  }
 0x17e   : > { %v634_v12 = vmax.f32 %v598_v7, 0.0 }
 0x17f   : > { %v635_v14 = vmax.f32 %v600_v10, 0.0 }
 0x180   : > { %v688_v16 = vpack.c.bf16 %v634_v12, %v632_v11  ;;  %v2312_v12 = vld [vmem:[#allocation5 + $0x50] ss:$8 sps:$4 sm:$0xff]  }
 0x181   : > { %v689_v18 = vpack.c.bf16 %v635_v14, %v633_v13  ;;  %v603_v20 = vpop.f32.mrb[4].mxu0 }
 0x182   : > { %v604_v22 = vadd.f32 %v603_v20, %v2983_v61  ;;  %v605_v23 = vpop.f32.mrb[5].mxu0 }
 0x183   : > { %920 = vmatprep.mubr.bf16.mxu1 %v689_v18  ;;  %v606_v24 = vadd.f32 %v605_v23, %v2986_v62  ;;  %v607_v25 = vpop.f32.mrb[6].mxu0  ;;  %v2323_v23 = vld [vmem:[#allocation5 + $0x84] ss:$8 sps:$4 sm:$0xff]  }
 0x184   : > { %921 = vmatmul.mubr.bf16.vlgmr.msra.gmra.mrb[0].mxu1 %v688_v16  ;;  %v636_v27 = vmax.f32 %v604_v22, 0.0  ;;  %v608_v28 = vadd.f32 %v607_v25, %v2983_v61  ;;  %v609_v29 = vpop.f32.mrb[7].mxu0  ;;  %v2320_v22 = vld [vmem:[#allocation5 + $0x74] ss:$8 sps:$4 sm:$0xff]   ;;  %v2324_v25 = vld [vmem:[#allocation5 + $0x90] ss:$8 sps:$4 sm:$0xff]  }
 0x185   : > { %1162 = vmatpush1.bf16.msra.mxu1 %v2297_v19  ;;  %v637_v32 = vmax.f32 %v606_v24, 0.0  ;;  %v610_v33 = vadd.f32 %v609_v29, %v2986_v62  ;;  %v2315_v19 = vld [vmem:[#allocation5 + $0x60] ss:$8 sps:$4 sm:$0xff]   ;;  %v2326_v24 = vld [vmem:[#allocation5 + $0x94] ss:$8 sps:$4 sm:$0xff]  }
 0x186   : > { %1163 = vmatprep.subr.bf16.mxu1 %v2302_v21  ;;  %v638_v35 = vmax.f32 %v608_v28, 0.0  ;;  %v2347_v21 = vld [vmem:[%s2941_s10 + $0x4] ss:$8 sps:$4 sm:$0xff]   ;;  %v2332_v28 = vld [vmem:[#allocation5 + $0xb4] ss:$8 sps:$4 sm:$0xff]  }
 0x187   : > { %v639_v36 = vmax.f32 %v610_v33, 0.0  ;;  %v2330_v29 = vld [vmem:[#allocation5 + $0xb0] ss:$8 sps:$4 sm:$0xff]  }
 0x188   : > { %v690_v38 = vpack.c.bf16 %v638_v35, %v636_v27  ;;  %v2327_v27 = vld [vmem:[#allocation5 + $0xa0] ss:$8 sps:$4 sm:$0xff]   ;;  %v2336_v33 = vld [vmem:[#allocation5 + $0xd0] ss:$8 sps:$4 sm:$0xff]  }
 0x189   : > { %1164 = vmatpush1.bf16.msra.mxu1 %v2300_v31  ;;  %v691_v41 = vpack.c.bf16 %v639_v36, %v637_v32  ;;  %v613_v42 = vpop.f32.mrb[8].mxu0  ;;  %v2333_v31 = vld [vmem:[#allocation5 + $0xc0] ss:$8 sps:$4 sm:$0xff]   ;;  %v2338_v32 = vld [vmem:[#allocation5 + $0xd4] ss:$8 sps:$4 sm:$0xff]  }
 0x18a   : > { %1165 = vmatprep.subr.bf16.mxu1 %v2305_v34  ;;  %v614_v44 = vadd.f32 %v613_v42, %v2983_v61  ;;  %v615_v45 = vpop.f32.mrb[9].mxu0  ;;  %v2341_v34 = vld [vmem:[#allocation5 + $0xe4] ss:$8 sps:$4 sm:$0xff]   ;;  %v2339_v35 = vld [vmem:[#allocation5 + $0xe0] ss:$8 sps:$4 sm:$0xff]  }
 0x18b   : > { %v616_v46 = vadd.f32 %v615_v45, %v2986_v62  ;;  %v617_v47 = vpop.f32.mrb[10].mxu0  ;;  %930 = vmatprep.mubr.bf16.mxu1 %v691_v41  ;;  %v2344_v36 = vld [vmem:[#allocation5 + $0xf4] ss:$8 sps:$4 sm:$0xff]   ;;  %v2351_v41 = vld [vmem:[%s2941_s10 + $0x24] ss:$8 sps:$4 sm:$0xff]  }
 0x18c   : > { %v640_v49 = vmax.f32 %v614_v44, 0.0  ;;  %v618_v50 = vadd.f32 %v617_v47, %v2983_v61  ;;  %v619_v51 = vpop.f32.mrb[11].mxu0  ;;  %931 = vmatmul.mubr.bf16.gmra.mrb[4].mxu1 %v690_v38  ;;  %v2345_v38 = vld [vmem:[%s2941_s10] ss:$8 sps:$4 sm:$0xff]   ;;  %v2356_v44 = vld [vmem:[%s2941_s10 + $0x30] ss:$8 sps:$4 sm:$0xff]  }
 0x18d   : > { %1166 = vmatpush1.bf16.msra.mxu1 %v2303_v40  ;;  %v641_v54 = vmax.f32 %v616_v46, 0.0  ;;  %v620_v55 = vadd.f32 %v619_v51, %v2986_v62  ;;  %v2350_v40 = vld [vmem:[%s2941_s10 + $0x10] ss:$8 sps:$4 sm:$0xff]   ;;  %v2353_v42 = vld [vmem:[%s2941_s10 + $0x20] ss:$8 sps:$4 sm:$0xff]  }
 0x18e   : > { %1167 = vmatprep.subr.bf16.mxu1 %v2308_v43  ;;  %v642_v59 = vmax.f32 %v618_v50, 0.0  ;;  %v2354_v43 = vld [vmem:[%s2941_s10 + $0x34] ss:$8 sps:$4 sm:$0xff]   ;;  %v2401_v45 = vld [vmem:[#allocation8 + $0xe4] ss:$8 sps:$4 sm:$0xff]   ;;  %s2563_s10 = scalar_lea.vmem %s3057_s27, 1024 }
 0x18f   : > { %v643_v60 = vmax.f32 %v620_v55, 0.0  ;;  %v2399_v46 = vld [vmem:[#allocation8 + $0xe0] ss:$8 sps:$4 sm:$0xff]   ;;  %1518 = vmatprep.subr.bf16.mxu0 %v2401_v45  ;;  %v2404_v47 = vld [vmem:[#allocation8 + $0xf4] ss:$8 sps:$4 sm:$0xff]   ;;  %p2564_p5 = scmp.ne.s32.totalorder %s3057_s27, %s2563_s10 }
 0x190   : > { %v692_v0 = vpack.c.bf16 %v642_v59, %v640_v49  ;;  %1519 = vmatpush1.bf16.msra.mxu0 %v2399_v46  ;;  %v2405_v49 = vld [vmem:[#allocation10 + $0x40] sm:$0xff]   ;;  %v2415_v45 = vld [vmem:[#allocation10 + $0x68] sm:$0xff]  }
 0x191   : > { %1168 = vmatpush1.bf16.msra.mxu1 %v2306_v53  ;;  %v693_v2 = vpack.c.bf16 %v643_v60, %v641_v54  ;;  %v623_v3 = vpop.f32.mrb[12].mxu0  ;;  %1520 = vmatprep.subr.bf16.mxu0 %v2404_v47  ;;  %v1234_v50 = vld [vmem:[%s3114_s6] sm:$0x3]  ;;  %p2565_p7 = pnand %p2564_p5, %p2883_p3 }
 0x192   : > { %1169 = vmatprep.subr.bf16.mxu1 %v2311_v57  ;;  %v624_v5 = vadd.f32 %v623_v3, %v2983_v61  ;;  %v625_v6 = vpop.f32.mrb[13].mxu0  ;;  %v3016_v51 = vrot.slane %v1234_v50, %v2975_v56  ;;  %v3019_v52 = vrot.slane %v1234_v50, %v2980_v58 }
 0x193   : > { %v626_v7 = vadd.f32 %v625_v6, %v2986_v62  ;;  %v627_v8 = vpop.f32.mrb[14].mxu0  ;;  %940 = vmatprep.mubr.bf16.mxu1 %v693_v2  ;;  %p2566_p12 = pneg %p2565_p7 }
 0x194   : > { %v644_v9 = vmax.f32 %v624_v5, 0.0  ;;  %v628_v10 = vadd.f32 %v627_v8, %v2983_v61  ;;  %v629_v11 = vpop.f32.mrb[15].mxu0  ;;  %941 = vmatmul.mubr.bf16.gmra.mrb[8].mxu1 %v692_v0  ;;  %v2318_v61 = vld [vmem:[#allocation5 + $0x70] ss:$8 sps:$4 sm:$0xff]   ;;  %1521 = vmatpush1.bf16.msra.mxu0 %v2402_v48  ;;  %v2406_v8 = vld [vmem:[#allocation10] sm:$0xff]  }
 0x195   : > { %1170 = vmatpush1.bf16.msra.mxu1 %v2309_v1  ;;  %v645_v13 = vmax.f32 %v626_v7, 0.0  ;;  %v630_v14 = vadd.f32 %v629_v11, %v2986_v62  ;;  %v2321_v62 = vld [vmem:[#allocation5 + $0x80] ss:$8 sps:$4 sm:$0xff]   ;;  %2092 = vmatprep.subr.bf16.mxu0 %v2405_v49 }
 0x196   : > { %1171 = vmatprep.subr.bf16.mxu1 %v2314_v4  ;;  %v646_v16 = vmax.f32 %v628_v10, 0.0  ;;  %v2407_v11 = vld [vmem:[#allocation10 + $0x48] sm:$0xff]  }
 0x197   : > { %v647_v17 = vmax.f32 %v630_v14, 0.0 }
 0x198   : > { %v694_v18 = vpack.c.bf16 %v646_v16, %v644_v9 }
 0x199   : > { %1172 = vmatpush1.bf16.msra.mxu1 %v2312_v12  ;;  %v695_v20 = vpack.c.bf16 %v647_v17, %v645_v13  ;;  %v2408_v17 = vld [vmem:[#allocation10 + $0x8] sm:$0xff]  }
 0x19a   : > { %1173 = vmatprep.subr.bf16.mxu1 %v2317_v15 }
 0x19b   : > { %950 = vmatprep.mubr.bf16.mxu1 %v695_v20  ;;  %v2409_v20 = vld [vmem:[#allocation10 + $0x50] sm:$0xff]  }
 0x19c   : > { %951 = vmatmul.mubr.bf16.gmra.mrb[12].mxu1 %v694_v18 }
 0x19d   : > { %1174 = vmatpush1.bf16.msra.mxu1 %v2315_v19  ;;  %1193 = vmatprep.mubr.bf16.mxu1 %v2347_v21 }
 0x19e   : > { %1175 = vmatprep.subr.bf16.mxu1 %v2320_v22 }
 0x1a1   : > { %1176 = vmatpush1.bf16.msra.mxu1 %v2318_v61 }
 0x1a2   : > { %1177 = vmatprep.subr.bf16.mxu1 %v2323_v23 }
 0x1a5   : > { %1178 = vmatpush1.bf16.msra.mxu1 %v2321_v62 }
 0x1a6   : > { %1179 = vmatprep.subr.bf16.mxu1 %v2326_v24  ;;  %v2410_v24 = vld [vmem:[#allocation10 + $0x10] sm:$0xff]  }
 0x1a9   : > { %1180 = vmatpush1.bf16.msra.mxu1 %v2324_v25 }
 0x1aa   : > { %1181 = vmatprep.subr.bf16.mxu1 %v2329_v26 }
 0x1ad   : > { %1182 = vmatpush1.bf16.msra.mxu1 %v2327_v27  ;;  %v2411_v27 = vld [vmem:[#allocation10 + $0x58] sm:$0xff]  }
 0x1ae   : > { %1183 = vmatprep.subr.bf16.mxu1 %v2332_v28 }
 0x1b1   : > { %1184 = vmatpush1.bf16.msra.mxu1 %v2330_v29 }
 0x1b2   : > { %1185 = vmatprep.subr.bf16.mxu1 %v2335_v30 }
 0x1b5   : > { %1186 = vmatpush1.bf16.msra.mxu1 %v2333_v31 }
 0x1b6   : > { %1187 = vmatprep.subr.bf16.mxu1 %v2338_v32 }
 0x1b9   : > { %1188 = vmatpush1.bf16.msra.mxu1 %v2336_v33  ;;  %v2412_v33 = vld [vmem:[#allocation10 + $0x18] sm:$0xff]  }
 0x1ba   : > { %1189 = vmatprep.subr.bf16.mxu1 %v2341_v34 }
 0x1bd   : > { %1190 = vmatpush1.bf16.msra.mxu1 %v2339_v35 }
 0x1be   : > { %1191 = vmatprep.subr.bf16.mxu1 %v2344_v36  ;;  %v2413_v36 = vld [vmem:[#allocation10 + $0x60] sm:$0xff]  }
 0x1c1   : > { %1192 = vmatpush1.bf16.msra.mxu1 %v2342_v37 }
 0x1c4   : > { %1194 = vmatmul.mubr.bf16.vlgmr.msra.gmra.mrb[0].mxu1 %v2345_v38 }
 0x1c5   : > { %1203 = vmatprep.mubr.bf16.mxu1 %v2348_v39 }
 0x1cc   : > { %1204 = vmatmul.mubr.bf16.gmra.mrb[4].mxu1 %v2350_v40 }
 0x1cd   : > { %1213 = vmatprep.mubr.bf16.mxu1 %v2351_v41 }
 0x1d4   : > { %1214 = vmatmul.mubr.bf16.gmra.mrb[8].mxu1 %v2353_v42  ;;  %v2414_v42 = vld [vmem:[#allocation10 + $0x20] sm:$0xff]  }
 0x1d5   : > { %1223 = vmatprep.mubr.bf16.mxu1 %v2354_v43 }
 0x1dc   : > { %1224 = vmatmul.mubr.bf16.gmra.mrb[12].mxu1 %v2356_v44 }
 0x297   : > { %v1195_v53 = vpop.f32.mrb[0].mxu1 }
 0x298   : > { %v1246_v54 = vadd.f32 %v3016_v51, %v1195_v53  ;;  %v1197_v55 = vpop.f32.mrb[1].mxu1  ;;  %v2416_v53 = vld [vmem:[#allocation10 + $0x28] sm:$0xff]  }
 0x299   : > { %v1247_v57 = vadd.f32 %v3019_v52, %v1197_v55  ;;  %v1199_v59 = vpop.f32.mrb[2].mxu1 }
 0x29a   : > { %v1248_v60 = vadd.f32 %v3016_v51, %v1199_v59  ;;  %v1201_v63 = vpop.f32.mrb[3].mxu1  ;;  %v1262_v1 = vmax.f32 %v1246_v54, 0.0 }
 0x29b   : > { %v1249_v0 = vadd.f32 %v3019_v52, %v1201_v63  ;;  %v1263_v3 = vmax.f32 %v1247_v57, 0.0 }
 0x29c   : > { %v1264_v2 = vmax.f32 %v1248_v60, 0.0 }
 0x29d   : > { %v1265_v4 = vmax.f32 %v1249_v0, 0.0  ;;  %v2417_v0 = vld [vmem:[#allocation10 + $0x70] sm:$0xff]  }
 0x29e   : > { %v1278_v5 = vpack.c.bf16 %v1264_v2, %v1262_v1  ;;  %v2418_v1 = vld [vmem:[#allocation10 + $0x30] sm:$0xff]   ;;  %v2420_v2 = vld [vmem:[#allocation10 + $0x38] sm:$0xff]  }
 0x29f   : > { %v1279_v6 = vpack.c.bf16 %v1265_v4, %v1263_v3  ;;  %v1205_v7 = vpop.f32.mrb[4].mxu1 }
 0x2a0   : > { %v1250_v9 = vadd.f32 %v3016_v51, %v1205_v7  ;;  %v1207_v10 = vpop.f32.mrb[5].mxu1 }
 0x2a1   : > { %v1251_v12 = vadd.f32 %v3019_v52, %v1207_v10  ;;  %v1209_v13 = vpop.f32.mrb[6].mxu1  ;;  %1522 = vmatprep.mubr.bf16.mxu0 %v1279_v6 }
 0x2a2   : > { %v1252_v14 = vadd.f32 %v3016_v51, %v1209_v13  ;;  %v1211_v15 = vpop.f32.mrb[7].mxu1  ;;  %1523 = vmatmul.mubr.bf16.vlgmr.msra.gmra.mrb[16].mxu0 %v1278_v5  ;;  %v1266_v18 = vmax.f32 %v1250_v9, 0.0 }
 0x2a3   : > { %v1253_v16 = vadd.f32 %v3019_v52, %v1211_v15  ;;  %2093 = vmatpush3.bf16.msra.mxu0 %v2406_v8  ;;  %v1267_v21 = vmax.f32 %v1251_v12, 0.0 }
 0x2a4   : > { %v1268_v19 = vmax.f32 %v1252_v14, 0.0  ;;  %2094 = vmatprep.subr.bf16.mxu0 %v2407_v11 }
 0x2a5   : > { %v1269_v22 = vmax.f32 %v1253_v16, 0.0 }
 0x2a6   : > { %v1280_v61 = vpack.c.bf16 %v1268_v19, %v1266_v18 }
 0x2a7   : > { %v1281_v23 = vpack.c.bf16 %v1269_v22, %v1267_v21  ;;  %v1215_v62 = vpop.f32.mrb[8].mxu1  ;;  %2095 = vmatpush3.bf16.msra.mxu0 %v2408_v17 }
 0x2a8   : > { %v1254_v25 = vadd.f32 %v3016_v51, %v1215_v62  ;;  %v1217_v26 = vpop.f32.mrb[9].mxu1  ;;  %2096 = vmatprep.subr.bf16.mxu0 %v2409_v20 }
 0x2a9   : > { %v1255_v28 = vadd.f32 %v3019_v52, %v1217_v26  ;;  %v1219_v29 = vpop.f32.mrb[10].mxu1  ;;  %1532 = vmatprep.mubr.bf16.mxu0 %v1281_v23 }
 0x2aa   : > { %v1256_v30 = vadd.f32 %v3016_v51, %v1219_v29  ;;  %v1221_v31 = vpop.f32.mrb[11].mxu1  ;;  %1533 = vmatmul.mubr.bf16.gmra.mrb[20].mxu0 %v1280_v61  ;;  %v1270_v34 = vmax.f32 %v1254_v25, 0.0 }
 0x2ab   : > { %v1257_v32 = vadd.f32 %v3019_v52, %v1221_v31  ;;  %2097 = vmatpush3.bf16.msra.mxu0 %v2410_v24  ;;  %v1271_v37 = vmax.f32 %v1255_v28, 0.0 }
 0x2ac   : > { %v1272_v35 = vmax.f32 %v1256_v30, 0.0  ;;  %2098 = vmatprep.subr.bf16.mxu0 %v2411_v27 }
 0x2ad   : > { %v1273_v38 = vmax.f32 %v1257_v32, 0.0 }
 0x2ae   : > { %v1282_v39 = vpack.c.bf16 %v1272_v35, %v1270_v34 }
 0x2af   : > { %v1283_v40 = vpack.c.bf16 %v1273_v38, %v1271_v37  ;;  %v1225_v41 = vpop.f32.mrb[12].mxu1  ;;  %2099 = vmatpush3.bf16.msra.mxu0 %v2412_v33 }
 0x2b0   : > { %v1258_v43 = vadd.f32 %v3016_v51, %v1225_v41  ;;  %v1227_v44 = vpop.f32.mrb[13].mxu1  ;;  %2100 = vmatprep.subr.bf16.mxu0 %v2413_v36 }
 0x2b1   : > { %v1259_v46 = vadd.f32 %v3019_v52, %v1227_v44  ;;  %v1229_v47 = vpop.f32.mrb[14].mxu1  ;;  %1542 = vmatprep.mubr.bf16.mxu0 %v1283_v40 }
 0x2b2   : > { %v1260_v48 = vadd.f32 %v3016_v51, %v1229_v47  ;;  %v1231_v49 = vpop.f32.mrb[15].mxu1  ;;  %1543 = vmatmul.mubr.bf16.gmra.mrb[24].mxu0 %v1282_v39  ;;  %v1274_v54 = vmax.f32 %v1258_v43, 0.0  ;;  %v2419_v51 = vld [vmem:[#allocation10 + $0x78] sm:$0xff]  }
 0x2b3   : > { %v1261_v50 = vadd.f32 %v3019_v52, %v1231_v49  ;;  %2101 = vmatpush3.bf16.msra.mxu0 %v2414_v42  ;;  %v1275_v57 = vmax.f32 %v1259_v46, 0.0  ;;  %v1318_v52 = vld [vmem:[%s3145_s15] sm:$0x3]  ;;  %s2569_s15 = scalar_lea.vmem %s2568_s23, 2048 }
 0x2b4   : > { %v1276_v55 = vmax.f32 %v1260_v48, 0.0  ;;  %2102 = vmatprep.subr.bf16.mxu0 %v2415_v45  ;;  %v1323_v3 = vrot.slane %v1318_v52, %v2975_v56  ;;  %v1327_v4 = vrot.slane %v1318_v52, %v2980_v58  ;;  %p2571_p2 = scmp.lt.s32.totalorder %s2569_s15, %s2563_s10 }
 0x2b5   : > { %v1277_v59 = vmax.f32 %v1261_v50, 0.0 }
 0x2b6   : > { %v1284_v60 = vpack.c.bf16 %v1276_v55, %v1274_v54  ;;  %p2572_p13 = por %p2571_p2, %p2570_p1 }
 0x2b7   : > { %v1285_v63 = vpack.c.bf16 %v1277_v59, %v1275_v57  ;;  %2103 = vmatpush3.bf16.msra.mxu0 %v2416_v53 }
 0x2b8   : > { %2104 = vmatprep.subr.bf16.mxu0 %v2417_v0  ;;  %v2067_v0 = vld [vmem:[%s3146_s8] ss:$0 sm:$0xff]  ;;  %p2573_p9 = pnand %p2572_p13, %p2566_p12 }
 0x2b9   : > { %1552 = vmatprep.mubr.bf16.mxu0 %v1285_v63 }
 0x2ba   : > { %1553 = vmatmul.mubr.bf16.gmra.mrb[28].mxu0 %v1284_v60 }
 0x2bb   : > { %2105 = vmatpush3.bf16.msra.mxu0 %v2418_v1 }
 0x2bc   : > { %2106 = vmatprep.subr.bf16.mxu0 %v2419_v51 }
 0x2bf   : > { %2107 = vmatpush3.bf16.msra.mxu0 %v2420_v2 }
 0x375   : > { %v1524_v5 = vpop.f32.mrb[16].mxu0 }
 0x376   : > { %v1525_v6 = vadd.f32 %v1524_v5, %v1323_v3  ;;  %v1526_v7 = vpop.f32.mrb[17].mxu0 }
 0x377   : > { %v1527_v8 = vadd.f32 %v1526_v7, %v1327_v4  ;;  %v1528_v9 = vpop.f32.mrb[18].mxu0 }
 0x378   : > { %v1529_v10 = vadd.f32 %v1528_v9, %v1323_v3  ;;  %v1530_v11 = vpop.f32.mrb[19].mxu0  ;;  %v1563_v13 = vmax.f32 %v1525_v6, 0.0 }
 0x379   : > { %v1531_v12 = vadd.f32 %v1530_v11, %v1327_v4  ;;  %v1564_v15 = vmax.f32 %v1527_v8, 0.0 }
 0x37a   : > { %v1565_v14 = vmax.f32 %v1529_v10, 0.0 }
 0x37b   : > { %v1566_v16 = vmax.f32 %v1531_v12, 0.0 }
 0x37c   : > { %v1579_v17 = vpack.c.bf16 %v1565_v14, %v1563_v13 }
 0x37d   : > { %v1580_v18 = vpack.c.bf16 %v1566_v16, %v1564_v15  ;;  %v1534_v19 = vpop.f32.mrb[20].mxu0 }
 0x37e   : > { %v1535_v20 = vadd.f32 %v1534_v19, %v1323_v3  ;;  %v1536_v21 = vpop.f32.mrb[21].mxu0 }
 0x37f   : > { %v1537_v56 = vadd.f32 %v1536_v21, %v1327_v4  ;;  %v1538_v22 = vpop.f32.mrb[22].mxu0  ;;  %1754 = vmatprep.mubr.bf16.mxu0 %v1580_v18 }
 0x380   : > { %v1539_v58 = vadd.f32 %v1538_v22, %v1323_v3  ;;  %v1540_v61 = vpop.f32.mrb[23].mxu0  ;;  %1755 = vmatmul.mubr.bf16.vlgmr.msra.gmra.mrb[32].mxu0 %v1579_v17  ;;  %v1567_v62 = vmax.f32 %v1535_v20, 0.0 }
 0x381   : > { %v1541_v23 = vadd.f32 %v1540_v61, %v1327_v4  ;;  %v1568_v25 = vmax.f32 %v1537_v56, 0.0 }
 0x382   : > { %v1569_v24 = vmax.f32 %v1539_v58, 0.0 }
 0x383   : > { %v1570_v26 = vmax.f32 %v1541_v23, 0.0 }
 0x384   : > { %v1581_v27 = vpack.c.bf16 %v1569_v24, %v1567_v62 }
 0x385   : > { %v1582_v28 = vpack.c.bf16 %v1570_v26, %v1568_v25  ;;  %v1544_v29 = vpop.f32.mrb[24].mxu0 }
 0x386   : > { %v1545_v30 = vadd.f32 %v1544_v29, %v1323_v3  ;;  %v1546_v31 = vpop.f32.mrb[25].mxu0 }
 0x387   : > { %v1547_v32 = vadd.f32 %v1546_v31, %v1327_v4  ;;  %v1548_v33 = vpop.f32.mrb[26].mxu0  ;;  %1762 = vmatprep.mubr.bf16.mxu0 %v1582_v28 }
 0x388   : > { %v1549_v34 = vadd.f32 %v1548_v33, %v1323_v3  ;;  %v1550_v35 = vpop.f32.mrb[27].mxu0  ;;  %1763 = vmatmul.mubr.bf16.gmra.mrb[36].mxu0 %v1581_v27  ;;  %v1571_v37 = vmax.f32 %v1545_v30, 0.0 }
 0x389   : > { %v1551_v36 = vadd.f32 %v1550_v35, %v1327_v4  ;;  %v1572_v39 = vmax.f32 %v1547_v32, 0.0 }
 0x38a   : > { %v1573_v38 = vmax.f32 %v1549_v34, 0.0 }
 0x38b   : > { %v1574_v40 = vmax.f32 %v1551_v36, 0.0 }
 0x38c   : > { %v1583_v41 = vpack.c.bf16 %v1573_v38, %v1571_v37 }
 0x38d   : > { %v1584_v42 = vpack.c.bf16 %v1574_v40, %v1572_v39  ;;  %v1554_v43 = vpop.f32.mrb[28].mxu0 }
 0x38e   : > { %v1555_v44 = vadd.f32 %v1554_v43, %v1323_v3  ;;  %v1556_v45 = vpop.f32.mrb[29].mxu0 }
 0x38f   : > { %v1557_v46 = vadd.f32 %v1556_v45, %v1327_v4  ;;  %v1558_v47 = vpop.f32.mrb[30].mxu0  ;;  %1770 = vmatprep.mubr.bf16.mxu0 %v1584_v42 }
 0x390   : > { %v1559_v48 = vadd.f32 %v1558_v47, %v1323_v3  ;;  %v1560_v49 = vpop.f32.mrb[31].mxu0  ;;  %1771 = vmatmul.mubr.bf16.gmra.mrb[40].mxu0 %v1583_v41  ;;  %v1575_v53 = vmax.f32 %v1555_v44, 0.0 }
 0x391   : > { %v1561_v50 = vadd.f32 %v1560_v49, %v1327_v4  ;;  %v1576_v55 = vmax.f32 %v1557_v46, 0.0 }
 0x392   : > { %v1577_v54 = vmax.f32 %v1559_v48, 0.0 }
 0x393   : > { %v1578_v57 = vmax.f32 %v1561_v50, 0.0 }
 0x394   : > { %v1585_v59 = vpack.c.bf16 %v1577_v54, %v1575_v53 }
 0x395   : > { %v1586_v60 = vpack.c.bf16 %v1578_v57, %v1576_v55 }
 0x397   : > { %1778 = vmatprep.mubr.bf16.mxu0 %v1586_v60 }
 0x398   : > { %1779 = vmatmul.mubr.bf16.gmra.mrb[44].mxu0 %v1585_v59 }
 0x453   : > { %v2108_v63 = vpop.f32.mrb[32].mxu0 }
 0x454   : > { %v2109_v1 = vpop.f32.mrb[33].mxu0 }
 0x455   : > { %v2110_v51 = vadd.f32 %v2109_v1, %v2108_v63  ;;  %v2111_v2 = vpop.f32.mrb[34].mxu0 }
 0x456   : > { %v2112_v52 = vpop.f32.mrb[35].mxu0 }
 0x457   : > { %v1757_v3 = vadd.f32 %v2110_v51, %v2067_v0  ;;  %v2113_v4 = vadd.f32 %v2112_v52, %v2111_v2 }
 0x459   : > { %1787 = vst [vmem:[%s3047_s22] sm:$0xff] %v1757_v3  ;;  %v1760_v5 = vadd.f32 %v2113_v4, %v2067_v0 }
 0x45b   : > { %1788 = vst [vmem:[%s3047_s22 + $0x8] sm:$0xff] %v1760_v5  ;;  %v2114_v6 = vpop.f32.mrb[36].mxu0 }
 0x45c   : > { %v2115_v7 = vpop.f32.mrb[37].mxu0 }
 0x45d   : > { %v2116_v8 = vadd.f32 %v2115_v7, %v2114_v6  ;;  %v2117_v9 = vpop.f32.mrb[38].mxu0 }
 0x45e   : > { %v2118_v10 = vpop.f32.mrb[39].mxu0 }
 0x45f   : > { %v1765_v11 = vadd.f32 %v2116_v8, %v2067_v0  ;;  %v2119_v12 = vadd.f32 %v2118_v10, %v2117_v9 }
 0x461   : > { %1789 = vst [vmem:[%s3047_s22 + $0x10] sm:$0xff] %v1765_v11  ;;  %v1768_v13 = vadd.f32 %v2119_v12, %v2067_v0 }
 0x463   : > { %1790 = vst [vmem:[%s3047_s22 + $0x18] sm:$0xff] %v1768_v13  ;;  %v2120_v14 = vpop.f32.mrb[40].mxu0 }
 0x464   : > { %v2121_v15 = vpop.f32.mrb[41].mxu0 }
 0x465   : > { %v2122_v16 = vadd.f32 %v2121_v15, %v2120_v14  ;;  %v2123_v17 = vpop.f32.mrb[42].mxu0 }
 0x466   : > { %v2124_v18 = vpop.f32.mrb[43].mxu0 }
 0x467   : > { %v1773_v19 = vadd.f32 %v2122_v16, %v2067_v0  ;;  %v2125_v20 = vadd.f32 %v2124_v18, %v2123_v17 }
 0x469   : > { %1791 = vst [vmem:[%s3047_s22 + $0x20] sm:$0xff] %v1773_v19  ;;  %v1776_v21 = vadd.f32 %v2125_v20, %v2067_v0 }
 0x46b   : > { %1792 = vst [vmem:[%s3047_s22 + $0x28] sm:$0xff] %v1776_v21  ;;  %v2126_v56 = vpop.f32.mrb[44].mxu0 }
 0x46c   : > { %v2127_v22 = vpop.f32.mrb[45].mxu0 }
 0x46d   : > { %v2128_v58 = vadd.f32 %v2127_v22, %v2126_v56  ;;  %v2129_v61 = vpop.f32.mrb[46].mxu0 }
 0x46e   : > { %v2130_v23 = vpop.f32.mrb[47].mxu0 }
 0x46f   : > { %v1781_v62 = vadd.f32 %v2128_v58, %v2067_v0  ;;  %v2131_v24 = vadd.f32 %v2130_v23, %v2129_v61 }
 0x471   : > { %1793 = vst [vmem:[%s3047_s22 + $0x30] sm:$0xff] %v1781_v62  ;;  %v1784_v25 = vadd.f32 %v2131_v24, %v2067_v0 }
 0x473   : > { %1794 = vst [vmem:[%s3047_s22 + $0x38] sm:$0xff] %v1784_v25 }
 0x474   : > { %2576 = shalt.err (!%p2573_p9)
}
 0x475   : > { %s2577_s16 = scalar_lea.hbm %s3062_s24, 1024  ;;  %s2581_s22 = scalar_lea.hbm %s3147_s13, 2048 }
 0x476   : > { %p2578_p0 = scmp.ne.s32.totalorder %s3062_s24, %s2577_s16  ;;  %p2582_p8 = scmp.lt.u32.totalorder %s3062_s24, %s3147_s13 }
 0x477   : > { %p2583_p6 = scmp.lt.u32.totalorder %s2581_s22, %s2577_s16  ;;  %p2585_p5 = scmp.lt.u32.totalorder %s2577_s16, %s3062_s24 }
 0x478   : > { %p2579_p11 = pnand %p2578_p0, %p2883_p3 }
 0x479   : > { %p2584_p10 = por %p2583_p6, %p2582_p8 }
 0x47a   : > { %p2580_p4 = pneg %p2579_p11 }
 0x47b   : > { %p2586_p7 = por %p2585_p5, %p2584_p10 }
 0x47d   : > { %p2587_p12 = pnand %p2586_p7, %p2580_p4 }
 0x47f   : > { %2590 = shalt.err (!%p2587_p12)
}
 0x480   : > { %s2650_s11 = smov 128   ;;  %s2651_s10 = smov 8  }
 0x481   : > { %2166 = dma.vmem_to_hbm [thread:$0]  (%p2883_p3), %s3057_s27, 1024, %s3062_s24, %s1796_s25, %s2650_s11, %s2650_s11, %s2651_s10  }
 0x482 PF: > { %s3148_s21 = sld [smem:[#allocation16_spill]]  ;;  %s3149_s23 = sld [smem:[#allocation17_spill]] }
 0x483   : > { %p3151_p2 = scmp.ge.s32.totalorder %s2637_s20, 2 }
 0x488   : > { %s1824_s15 = sand.u32 1, %s3148_s21   ;;  %p3150_p1 = scmp.ne.s32.totalorder %s3149_s23, 0 }
 0x489   : > { %s1825_s16 = scalar_lea.sflag [#allocation4], %s1824_s15 }
 0x48a   : > { %p2186_p13 = pnand %p3151_p2, %p3150_p1 }
 0x48c   : > { %2620 = dma.done.wait (!%p2186_p13), %s1825_s16, 1024  }
 0x48d   : > { %2622 = vsyncadd (!%p2186_p13), %s1825_s16, 4294966272  ;;  %s3152_s30 = smov %s2870_s17  ;;  %p26_p9 = scmp.ge.s32.totalorder %s2870_s17, 4  }
 0x48e   : > { %s3153_s17 = smov %s2629_s18  ;;  %s3154_s18 = smov %s2633_s19 }
 0x48f   : > { %s3155_s19 = smov %s2879_s29  ;;  %s3156_s20 = smov %s3152_s30 }
 0x490   :  { %28 = sbr.rel (!%p26_p9) target bundleno = 11 (0xb), region = 128 }
 0x497   :  { %1830 = vsyncpa [#allocation3], 1 }
 0x498   :  { %1832 = vsyncpa [#allocation3 + $0x1], 1 }
 0x499   :  { %1833 = vsyncpa [#allocation6], 1 }
 0x49a   :  { %1834 = vsyncpa [#allocation9], 1 }
 0x49b   :  { %1835 = vsyncpa [#allocation4], 1 }
 0x49c   :  { %1837 = vsyncpa [#allocation4 + $0x1], 1 }

</bundles_post_ra>
